<compile_context>
chip_gen: v5e
topology: v5e:2x2
jax: 0.10.0
libtpu: 0.0.40
codegen_flags: <defaults>
</compile_context>

<pallas_src>
import functools

import jax
import jax.numpy as jnp
from jax.experimental import pallas as pl
from jax.experimental.pallas import tpu as pltpu

EPS = 1e-5  # LayerNorm eps used in the reference implementation


def _layernorm(x, scale, shift):
    mean = jnp.mean(x, axis=-1, keepdims=True)
    var = jnp.mean((x - mean) ** 2, axis=-1, keepdims=True)  # unbiased=False
    return scale * (x - mean) * jax.lax.rsqrt(var + EPS) + shift


def _gelu(x):
    # tanh-approx GELU (as in the reference FeedForward)
    return 0.5 * x * (1.0 + jnp.tanh(jnp.sqrt(2.0 / jnp.pi) * (x + 0.044715 * x ** 3)))


def transformer_block_kernel(n_heads, compute_dtype,
                             x_ref, wqkv_ref, wo_ref, bo_ref,
                             n1s_ref, n1b_ref, n2s_ref, n2b_ref,
                             w1_ref, b1_ref, w2_ref, b2_ref,
                             o_ref,
                             k_buf, v_buf):
    tq = x_ref.shape[1]           # q-tile length (== KV tile length)
    D = x_ref.shape[2]
    H = n_heads
    hd = D // H
    cdt = compute_dtype

    qi = pl.program_id(1)
    q_start = pl.multiple_of(qi * tq, tq)

    x_t = x_ref[0]                                            # (tq, D) f32 residual rows

    # ---- LN1 + fused QKV projection for THIS tile's rows only ----
    xn = _layernorm(x_t, n1s_ref[0], n1b_ref[0])
    qkv = jnp.dot(xn.astype(cdt), wqkv_ref[...],
                  preferred_element_type=jnp.float32)         # (tq, 3D) f32 acc
    # 1/sqrt(hd) is already folded into the Q columns of wqkv (wrapper).

    def split_heads(a2d):                                     # (tq, D) -> (H, tq, hd)
        return jnp.stack([a2d[:, h * hd:(h + 1) * hd] for h in range(H)], axis=0)

    q_t = split_heads(qkv[:, :D]).astype(cdt)                 # stays local (no scratch)
    k_t = split_heads(qkv[:, D:2 * D]).astype(cdt)
    v_t = split_heads(qkv[:, 2 * D:]).astype(cdt)

    # Append this tile's K/V rows; causality => every key this / later q-tiles need was
    # written by this / earlier sequential grid steps of the same batch element.
    k_buf[:, pl.ds(q_start, tq), :] = k_t
    v_buf[:, pl.ds(q_start, tq), :] = v_t

    # ---- causal attention over KV tiles 0..qi with online softmax (flash style) ----
    row = q_start + jax.lax.broadcasted_iota(jnp.int32, (tq, tq), 0)   # global query idx

    def kv_step(j, carry):
        m, l, acc = carry
        kv_start = pl.multiple_of(j * tq, tq)
        k_j = k_buf[:, pl.ds(kv_start, tq), :]                # (H, tq, hd)
        v_j = v_buf[:, pl.ds(kv_start, tq), :]
        s = jnp.einsum('hqd,hkd->hqk', q_t, k_j,
                       preferred_element_type=jnp.float32)    # (H, tq, tq)
        col = kv_start + jax.lax.broadcasted_iota(jnp.int32, (tq, tq), 1)
        s = jnp.where((col <= row)[None], s, -jnp.inf)
        m_new = jnp.maximum(m, jnp.max(s, axis=-1, keepdims=True))
        alpha = jnp.exp(m - m_new)
        p = jnp.exp(s - m_new)
        l_new = alpha * l + jnp.sum(p, axis=-1, keepdims=True)
        acc_new = alpha * acc + jnp.einsum('hqk,hkd->hqd', p.astype(cdt), v_j,
                                           preferred_element_type=jnp.float32)
        return m_new, l_new, acc_new

    m0 = jnp.full((H, tq, 1), -jnp.inf, jnp.float32)
    l0 = jnp.zeros((H, tq, 1), jnp.float32)
    a0 = jnp.zeros((H, tq, hd), jnp.float32)
    # KV tiles above the causal diagonal (j > qi) are skipped entirely.
    _, l_f, acc_f = jax.lax.fori_loop(0, qi + 1, kv_step, (m0, l0, a0))
    ctx = acc_f * pl.reciprocal(l_f, approx=True)             # (H, tq, hd) f32
    # attention-weight dropout: identity (drop_rate = 0 / eval)

    # ---- output projection: single full-depth (tq, D) x (D, D) MXU pass ----
    ctx2 = jnp.concatenate([ctx[h] for h in range(H)], axis=-1)   # (tq, D)
    attn = jnp.dot(ctx2.astype(cdt), wo_ref[...],
                   preferred_element_type=jnp.float32)
    # drop_resid: identity
    x1 = x_t + attn + bo_ref[0]

    # ---- feed-forward sub-block ----
    xn2 = _layernorm(x1, n2s_ref[0], n2b_ref[0])
    h1 = jnp.dot(xn2.astype(cdt), w1_ref[...],
                 preferred_element_type=jnp.float32) + b1_ref[0]
    h1 = _gelu(h1)
    ff = jnp.dot(h1.astype(cdt), w2_ref[...],
                 preferred_element_type=jnp.float32) + b2_ref[0]
    # drop_resid: identity
    o_ref[0] = (x1 + ff).astype(o_ref.dtype)


def transformer_block(x, params, n_heads, *, tq=None, compute_dtype=jnp.bfloat16):
    (wq, wk, wv, wo, bo, n1s, n1b, n2s, n2b, w1, b1, w2, b2) = params
    B, T, D = x.shape
    hd = D // n_heads
    H4 = w1.shape[1]
    cdt = compute_dtype

    # ---- per-generation sizing (v7x: 64 MiB VMEM -> small tq; v5e/v6e: 128 MiB) ----
    try:
        vmem_cap = int(pltpu.get_tpu_info().vmem_capacity_bytes)
    except Exception:
        vmem_cap = 64 * 1024 * 1024
    vmem_limit = max(32 * 1024 * 1024, int(0.85 * vmem_cap))
    if tq is None:
        tq = 128 if vmem_cap <= 64 * 1024 * 1024 else 256
    tq = min(tq, T)
    if T % tq != 0:
        tq = T   # TODO(synk): support ragged T via padding / pl.BoundedSlice instead

    # Weight prep (in production hoist this out of the step function, done once at load):
    # fold 1/sqrt(hd) into the Q columns so the kernel never rescales activations.
    wqkv = jnp.concatenate([wq * (1.0 / float(hd) ** 0.5), wk, wv], axis=1).astype(cdt)
    wo_c, w1_c, w2_c = wo.astype(cdt), w1.astype(cdt), w2.astype(cdt)

    flops = int(2 * B * T * D * 3 * D          # QKV projection
                + 2 * B * T * T * D            # QK^T (causal upper bound)
                + 2 * B * T * T * D            # P @ V
                + 2 * B * T * D * D            # output projection
                + 4 * B * T * D * H4)          # MLP (two matmuls)
    transcendentals = int(B * n_heads * T * T + B * T * H4)
    bytes_accessed = int(2 * B * T * D * 4
                         + 2 * (wqkv.size + wo_c.size + w1_c.size + w2_c.size)
                         + 4 * (bo.size + n1s.size + n1b.size + n2s.size
                                + n2b.size + b1.size + b2.size))

    def build(single_buffer_weights):
        def const(shape):
            imap = lambda b, qi: (0,) * len(shape)
            if single_buffer_weights:
                # constant index_map -> a second pipeline buffer is pure VMEM waste
                return pl.BlockSpec(shape, imap, pipeline_mode=pl.Buffered(1))
            return pl.BlockSpec(shape, imap)

        in_specs = [
            pl.BlockSpec((1, tq, D), lambda b, qi: (b, qi, 0)),   # x tile (LN1/QKV + residual)
            const((D, 3 * D)),                                    # fused Wqkv (q pre-scaled)
            const((D, D)),                                        # Wo
            const((1, D)),                                        # bo
            const((1, D)), const((1, D)),                         # norm1 scale / shift
            const((1, D)), const((1, D)),                         # norm2 scale / shift
            const((D, H4)), const((1, H4)),                       # ff W1, b1
            const((H4, D)), const((1, D)),                        # ff W2, b2
        ]
        return pl.pallas_call(
            functools.partial(transformer_block_kernel, n_heads, cdt),
            out_shape=jax.ShapeDtypeStruct((B, T, D), x.dtype),
            grid_spec=pltpu.PrefetchScalarGridSpec(
                num_scalar_prefetch=0,
                grid=(B, T // tq),
                in_specs=in_specs,
                out_specs=pl.BlockSpec((1, tq, D), lambda b, qi: (b, qi, 0)),
                scratch_shapes=[
                    pltpu.VMEM((n_heads, T, hd), cdt),   # K rows written so far
                    pltpu.VMEM((n_heads, T, hd), cdt),   # V rows written so far
                ],
            ),
            compiler_params=pltpu.CompilerParams(
                # TODO(synk): for B=1 on v7x, split heads / q-tiles across the two
                #             TensorCores (core_map) so the second core is not idle.
                dimension_semantics=("parallel", "arbitrary"),
                vmem_limit_bytes=vmem_limit,
            ),
            cost_estimate=pl.CostEstimate(flops=flops,
                                          transcendentals=transcendentals,
                                          bytes_accessed=bytes_accessed),
        )

    args = (x, wqkv, wo_c, bo, n1s, n1b, n2s, n2b, w1_c, b1, w2_c, b2)
    try:
        return build(True)(*args)
    except Exception:
        # pl.Buffered(1) not supported on this jax/libtpu: fall back to default
        # double-buffered weight blocks (correctness unaffected).
        return build(False)(*args)


# ---------------- pure-JAX reference (for verification) ----------------
def transformer_block_ref(x, params, n_heads):
    (wq, wk, wv, wo, bo, n1s, n1b, n2s, n2b, w1, b1, w2, b2) = params
    B, T, D = x.shape
    hd = D // n_heads

    def ln(a, s, b_):
        m = a.mean(-1, keepdims=True)
        v = ((a - m) ** 2).mean(-1, keepdims=True)
        return s[0] * (a - m) / jnp.sqrt(v + EPS) + b_[0]

    xn = ln(x, n1s, n1b)
    q = (xn @ wq).reshape(B, T, n_heads, hd).transpose(0, 2, 1, 3)
    k = (xn @ wk).reshape(B, T, n_heads, hd).transpose(0, 2, 1, 3)
    v = (xn @ wv).reshape(B, T, n_heads, hd).transpose(0, 2, 1, 3)
    s = jnp.einsum('bhqd,bhkd->bhqk', q, k) / jnp.sqrt(jnp.float32(hd))
    mask = jnp.tril(jnp.ones((T, T), bool))
    s = jnp.where(mask, s, -jnp.inf)
    p = jax.nn.softmax(s, axis=-1)
    ctx = jnp.einsum('bhqk,bhkd->bhqd', p, v).transpose(0, 2, 1, 3).reshape(B, T, D)
    x1 = x + (ctx @ wo + bo[0])

    xn2 = ln(x1, n2s, n2b)
    h = xn2 @ w1 + b1[0]
    h = 0.5 * h * (1.0 + jnp.tanh(jnp.sqrt(2.0 / jnp.pi) * (h + 0.044715 * h ** 3)))
    return x1 + (h @ w2 + b2[0])


if __name__ == "__main__":
    # cfg: emb_dim=32, context_length=8, n_heads=4, drop_rate=0.0, qkv_bias=False
    B, T, D, n_heads = 2, 8, 32, 4
    H4 = 4 * D

    key = jax.random.PRNGKey(0)
    keys = jax.random.split(key, 10)
    x = jax.random.normal(keys[0], (B, T, D), jnp.float32)

    wq = 0.02 * jax.random.normal(keys[1], (D, D), jnp.float32)
    wk = 0.02 * jax.random.normal(keys[2], (D, D), jnp.float32)
    wv = 0.02 * jax.random.normal(keys[3], (D, D), jnp.float32)
    wo = 0.02 * jax.random.normal(keys[4], (D, D), jnp.float32)
    bo = 0.01 * jax.random.normal(keys[5], (1, D), jnp.float32)
    n1s = jnp.ones((1, D), jnp.float32)
    n1b = jnp.zeros((1, D), jnp.float32)
    n2s = jnp.ones((1, D), jnp.float32)
    n2b = jnp.zeros((1, D), jnp.float32)
    w1 = 0.02 * jax.random.normal(keys[6], (D, H4), jnp.float32)
    b1 = 0.01 * jax.random.normal(keys[7], (1, H4), jnp.float32)
    w2 = 0.02 * jax.random.normal(keys[8], (H4, D), jnp.float32)
    b2 = 0.01 * jax.random.normal(keys[9], (1, D), jnp.float32)

    params = (wq, wk, wv, wo, bo, n1s, n1b, n2s, n2b, w1, b1, w2, b2)

    out = transformer_block(x, params, n_heads)
    out = jax.block_until_ready(out)

    ref = transformer_block_ref(x, params, n_heads)
    assert out.shape == (B, T, D)
    # bf16 MXU inputs + EUP approx reciprocal -> expect ~1e-3 level error vs f32 reference
    err = float(jnp.max(jnp.abs(out - ref)))
    assert err < 2e-2, err

    print("KERNEL_OK")
</pallas_src>

<mosaic_0001>
module attributes {stable_mosaic.version = 11 : i64} {
  func.func @transformer_block_kernel(%arg0: i32, %arg1: i32, %arg2: memref<1x8x32xf32, #tpu.memory_space<vmem>>, %arg3: memref<32x96xbf16, #tpu.memory_space<vmem>>, %arg4: memref<32x32xbf16, #tpu.memory_space<vmem>>, %arg5: memref<1x32xf32, #tpu.memory_space<vmem>>, %arg6: memref<1x32xf32, #tpu.memory_space<vmem>>, %arg7: memref<1x32xf32, #tpu.memory_space<vmem>>, %arg8: memref<1x32xf32, #tpu.memory_space<vmem>>, %arg9: memref<1x32xf32, #tpu.memory_space<vmem>>, %arg10: memref<32x128xbf16, #tpu.memory_space<vmem>>, %arg11: memref<1x128xf32, #tpu.memory_space<vmem>>, %arg12: memref<128x32xbf16, #tpu.memory_space<vmem>>, %arg13: memref<1x32xf32, #tpu.memory_space<vmem>>, %arg14: memref<1x8x32xf32, #tpu.memory_space<vmem>>, %arg15: memref<4x8x8xbf16, #tpu.memory_space<vmem>>, %arg16: memref<4x8x8xbf16, #tpu.memory_space<vmem>>) attributes {dimension_semantics = [#tpu.dimension_semantics<parallel>, #tpu.dimension_semantics<arbitrary>], iteration_bounds = array<i64: 2, 1>, scalar_prefetch = 0 : i64, scratch_operands = 2 : i64, tpu.core_type = #tpu.core_type<tc>, window_params = [{transform_indices = @transform_0, window_bounds = array<i64: 1, 8, 32>}, {pipeline_mode = #tpu.pipeline_mode<synchronous>, transform_indices = @transform_1, window_bounds = array<i64: 32, 96>}, {pipeline_mode = #tpu.pipeline_mode<synchronous>, transform_indices = @transform_2, window_bounds = array<i64: 32, 32>}, {pipeline_mode = #tpu.pipeline_mode<synchronous>, transform_indices = @transform_3, window_bounds = array<i64: 1, 32>}, {pipeline_mode = #tpu.pipeline_mode<synchronous>, transform_indices = @transform_4, window_bounds = array<i64: 1, 32>}, {pipeline_mode = #tpu.pipeline_mode<synchronous>, transform_indices = @transform_5, window_bounds = array<i64: 1, 32>}, {pipeline_mode = #tpu.pipeline_mode<synchronous>, transform_indices = @transform_6, window_bounds = array<i64: 1, 32>}, {pipeline_mode = #tpu.pipeline_mode<synchronous>, transform_indices = @transform_7, window_bounds = array<i64: 1, 32>}, {pipeline_mode = #tpu.pipeline_mode<synchronous>, transform_indices = @transform_8, window_bounds = array<i64: 32, 128>}, {pipeline_mode = #tpu.pipeline_mode<synchronous>, transform_indices = @transform_9, window_bounds = array<i64: 1, 128>}, {pipeline_mode = #tpu.pipeline_mode<synchronous>, transform_indices = @transform_10, window_bounds = array<i64: 128, 32>}, {pipeline_mode = #tpu.pipeline_mode<synchronous>, transform_indices = @transform_11, window_bounds = array<i64: 1, 32>}, {transform_indices = @transform_12, window_bounds = array<i64: 1, 8, 32>}]} {
    %c8_i32 = arith.constant 8 : i32
    %0 = arith.muli %arg1, %c8_i32 : i32
    %1 = tpu.assume_multiple %0, 8 : i32
    %c0 = arith.constant 0 : index
    %c0_0 = arith.constant 0 : index
    %c0_1 = arith.constant 0 : index
    %2 = vector.load %arg2[%c0, %c0_0, %c0_1] : memref<1x8x32xf32, #tpu.memory_space<vmem>>, vector<1x8x32xf32>
    %3 = vector.shape_cast %2 : vector<1x8x32xf32> to vector<8x32xf32>
    %c0_2 = arith.constant 0 : index
    %c0_3 = arith.constant 0 : index
    %4 = vector.load %arg6[%c0_2, %c0_3] : memref<1x32xf32, #tpu.memory_space<vmem>>, vector<1x32xf32>
    %5 = vector.shape_cast %4 : vector<1x32xf32> to vector<32xf32>
    %c0_4 = arith.constant 0 : index
    %c0_5 = arith.constant 0 : index
    %6 = vector.load %arg7[%c0_4, %c0_5] : memref<1x32xf32, #tpu.memory_space<vmem>>, vector<1x32xf32>
    %7 = vector.shape_cast %6 : vector<1x32xf32> to vector<32xf32>
    %cst = arith.constant dense<0.000000e+00> : vector<8xf32>
    %8 = vector.multi_reduction <add>, %3, %cst [1] : vector<8x32xf32> to vector<8xf32>
    %9 = vector.shape_cast %8 : vector<8xf32> to vector<8x1xf32>
    %cst_6 = arith.constant 3.200000e+01 : f32
    %10 = vector.broadcast %cst_6 : f32 to vector<8x1xf32>
    %11 = arith.divf %9, %10 : vector<8x1xf32>
    %12 = vector.broadcast %11 : vector<8x1xf32> to vector<8x32xf32>
    %13 = arith.subf %3, %12 : vector<8x32xf32>
    %14 = arith.mulf %13, %13 : vector<8x32xf32>
    %cst_7 = arith.constant dense<0.000000e+00> : vector<8xf32>
    %15 = vector.multi_reduction <add>, %14, %cst_7 [1] : vector<8x32xf32> to vector<8xf32>
    %16 = vector.shape_cast %15 : vector<8xf32> to vector<8x1xf32>
    %cst_8 = arith.constant 3.200000e+01 : f32
    %17 = vector.broadcast %cst_8 : f32 to vector<8x1xf32>
    %18 = arith.divf %16, %17 : vector<8x1xf32>
    %19 = vector.broadcast %11 : vector<8x1xf32> to vector<8x32xf32>
    %20 = arith.subf %3, %19 : vector<8x32xf32>
    %21 = vector.shape_cast %5 : vector<32xf32> to vector<1x32xf32>
    %22 = vector.broadcast %21 : vector<1x32xf32> to vector<8x32xf32>
    %23 = arith.mulf %22, %20 : vector<8x32xf32>
    %cst_9 = arith.constant 9.99999974E-6 : f32
    %24 = vector.broadcast %cst_9 : f32 to vector<8x1xf32>
    %25 = arith.addf %18, %24 : vector<8x1xf32>
    %26 = math.rsqrt %25 : vector<8x1xf32>
    %27 = vector.broadcast %26 : vector<8x1xf32> to vector<8x32xf32>
    %28 = arith.mulf %23, %27 : vector<8x32xf32>
    %29 = vector.shape_cast %7 : vector<32xf32> to vector<1x32xf32>
    %30 = vector.broadcast %29 : vector<1x32xf32> to vector<8x32xf32>
    %31 = arith.addf %28, %30 : vector<8x32xf32>
    %32 = arith.truncf %31 : vector<8x32xf32> to vector<8x32xbf16>
    %c0_10 = arith.constant 0 : index
    %c0_11 = arith.constant 0 : index
    %33 = vector.load %arg3[%c0_10, %c0_11] : memref<32x96xbf16, #tpu.memory_space<vmem>>, vector<32x96xbf16>
    %cst_12 = arith.constant dense<0.000000e+00> : vector<8x96xf32>
    %34 = tpu.matmul %32, %33, %cst_12 {dimension_numbers = #tpu.dot_dimension_numbers<[1], [0], [0], [1], [0, 0, 1, 1], [], []>} : vector<8x32xbf16>, vector<32x96xbf16>, vector<8x96xf32> -> vector<8x96xf32>
    %35 = vector.extract_strided_slice %34 {offsets = [0, 0], sizes = [8, 32], strides = [1, 1]} : vector<8x96xf32> to vector<8x32xf32>
    %36 = vector.extract_strided_slice %35 {offsets = [0, 0], sizes = [8, 8], strides = [1, 1]} : vector<8x32xf32> to vector<8x8xf32>
    %37 = vector.extract_strided_slice %35 {offsets = [0, 8], sizes = [8, 8], strides = [1, 1]} : vector<8x32xf32> to vector<8x8xf32>
    %38 = vector.extract_strided_slice %35 {offsets = [0, 16], sizes = [8, 8], strides = [1, 1]} : vector<8x32xf32> to vector<8x8xf32>
    %39 = vector.extract_strided_slice %35 {offsets = [0, 24], sizes = [8, 8], strides = [1, 1]} : vector<8x32xf32> to vector<8x8xf32>
    %40 = vector.shape_cast %36 : vector<8x8xf32> to vector<1x8x8xf32>
    %41 = vector.shape_cast %37 : vector<8x8xf32> to vector<1x8x8xf32>
    %42 = vector.shape_cast %38 : vector<8x8xf32> to vector<1x8x8xf32>
    %43 = vector.shape_cast %39 : vector<8x8xf32> to vector<1x8x8xf32>
    %44 = tpu.concatenate %40, %41, %42, %43 in 0 : vector<1x8x8xf32>, vector<1x8x8xf32>, vector<1x8x8xf32>, vector<1x8x8xf32> -> vector<4x8x8xf32>
    %45 = arith.truncf %44 : vector<4x8x8xf32> to vector<4x8x8xbf16>
    %46 = vector.extract_strided_slice %34 {offsets = [0, 32], sizes = [8, 32], strides = [1, 1]} : vector<8x96xf32> to vector<8x32xf32>
    %47 = vector.extract_strided_slice %46 {offsets = [0, 0], sizes = [8, 8], strides = [1, 1]} : vector<8x32xf32> to vector<8x8xf32>
    %48 = vector.extract_strided_slice %46 {offsets = [0, 8], sizes = [8, 8], strides = [1, 1]} : vector<8x32xf32> to vector<8x8xf32>
    %49 = vector.extract_strided_slice %46 {offsets = [0, 16], sizes = [8, 8], strides = [1, 1]} : vector<8x32xf32> to vector<8x8xf32>
    %50 = vector.extract_strided_slice %46 {offsets = [0, 24], sizes = [8, 8], strides = [1, 1]} : vector<8x32xf32> to vector<8x8xf32>
    %51 = vector.shape_cast %47 : vector<8x8xf32> to vector<1x8x8xf32>
    %52 = vector.shape_cast %48 : vector<8x8xf32> to vector<1x8x8xf32>
    %53 = vector.shape_cast %49 : vector<8x8xf32> to vector<1x8x8xf32>
    %54 = vector.shape_cast %50 : vector<8x8xf32> to vector<1x8x8xf32>
    %55 = tpu.concatenate %51, %52, %53, %54 in 0 : vector<1x8x8xf32>, vector<1x8x8xf32>, vector<1x8x8xf32>, vector<1x8x8xf32> -> vector<4x8x8xf32>
    %56 = arith.truncf %55 : vector<4x8x8xf32> to vector<4x8x8xbf16>
    %57 = vector.extract_strided_slice %34 {offsets = [0, 64], sizes = [8, 32], strides = [1, 1]} : vector<8x96xf32> to vector<8x32xf32>
    %58 = vector.extract_strided_slice %57 {offsets = [0, 0], sizes = [8, 8], strides = [1, 1]} : vector<8x32xf32> to vector<8x8xf32>
    %59 = vector.extract_strided_slice %57 {offsets = [0, 8], sizes = [8, 8], strides = [1, 1]} : vector<8x32xf32> to vector<8x8xf32>
    %60 = vector.extract_strided_slice %57 {offsets = [0, 16], sizes = [8, 8], strides = [1, 1]} : vector<8x32xf32> to vector<8x8xf32>
    %61 = vector.extract_strided_slice %57 {offsets = [0, 24], sizes = [8, 8], strides = [1, 1]} : vector<8x32xf32> to vector<8x8xf32>
    %62 = vector.shape_cast %58 : vector<8x8xf32> to vector<1x8x8xf32>
    %63 = vector.shape_cast %59 : vector<8x8xf32> to vector<1x8x8xf32>
    %64 = vector.shape_cast %60 : vector<8x8xf32> to vector<1x8x8xf32>
    %65 = vector.shape_cast %61 : vector<8x8xf32> to vector<1x8x8xf32>
    %66 = tpu.concatenate %62, %63, %64, %65 in 0 : vector<1x8x8xf32>, vector<1x8x8xf32>, vector<1x8x8xf32>, vector<1x8x8xf32> -> vector<4x8x8xf32>
    %67 = arith.truncf %66 : vector<4x8x8xf32> to vector<4x8x8xbf16>
    %c0_13 = arith.constant 0 : index
    %68 = arith.index_cast %1 : i32 to index
    %c0_14 = arith.constant 0 : index
    %69 = vector.load %arg15[%c0_13, %68, %c0_14] : memref<4x8x8xbf16, #tpu.memory_space<vmem>>, vector<4x8x8xbf16>
    tpu.vector_store %arg15[%c0_13, %68, %c0_14], %56 {strides = array<i32>} : memref<4x8x8xbf16, #tpu.memory_space<vmem>>, vector<4x8x8xbf16>,
    %c0_15 = arith.constant 0 : index
    %70 = arith.index_cast %1 : i32 to index
    %c0_16 = arith.constant 0 : index
    %71 = vector.load %arg16[%c0_15, %70, %c0_16] : memref<4x8x8xbf16, #tpu.memory_space<vmem>>, vector<4x8x8xbf16>
    tpu.vector_store %arg16[%c0_15, %70, %c0_16], %67 {strides = array<i32>} : memref<4x8x8xbf16, #tpu.memory_space<vmem>>, vector<4x8x8xbf16>,
    %72 = tpu.iota {dimensions = array<i32: 0>} : vector<8x8xi32>
    %73 = vector.broadcast %1 : i32 to vector<8x8xi32>
    %74 = arith.addi %73, %72 : vector<8x8xi32>
    %cst_17 = arith.constant 0xFF800000 : f32
    %75 = vector.broadcast %cst_17 : f32 to vector<4x8x1xf32>
    %cst_18 = arith.constant 0.000000e+00 : f32
    %76 = vector.broadcast %cst_18 : f32 to vector<4x8x1xf32>
    %cst_19 = arith.constant 0.000000e+00 : f32
    %77 = vector.broadcast %cst_19 : f32 to vector<4x8x8xf32>
    %c1_i32 = arith.constant 1 : i32
    %78 = arith.addi %arg1, %c1_i32 : i32
    %c0_i32 = arith.constant 0 : i32
    %79 = arith.subi %78, %c0_i32 : i32
    %80 = arith.addi %c0_i32, %79 : i32
    %c1_i32_20 = arith.constant 1 : i32
    %81:3 = scf.for %arg17 = %c0_i32 to %80 step %c1_i32_20 iter_args(%arg18 = %75, %arg19 = %76, %arg20 = %77) -> (vector<4x8x1xf32>, vector<4x8x1xf32>, vector<4x8x8xf32>)  : i32 {
      %c8_i32_52 = arith.constant 8 : i32
      %165 = arith.muli %arg17, %c8_i32_52 : i32
      %166 = tpu.assume_multiple %165, 8 : i32
      %c0_53 = arith.constant 0 : index
      %167 = arith.index_cast %166 : i32 to index
      %c0_54 = arith.constant 0 : index
      %168 = vector.load %arg15[%c0_53, %167, %c0_54] : memref<4x8x8xbf16, #tpu.memory_space<vmem>>, vector<4x8x8xbf16>
      %c0_55 = arith.constant 0 : index
      %169 = arith.index_cast %166 : i32 to index
      %c0_56 = arith.constant 0 : index
      %170 = vector.load %arg16[%c0_55, %169, %c0_56] : memref<4x8x8xbf16, #tpu.memory_space<vmem>>, vector<4x8x8xbf16>
      "tpu.trace_start"() <{level = 10 : i32, message = "hqd,hkd->hqk"}> : () -> ()
      %cst_57 = arith.constant dense<0.000000e+00> : vector<4x8x8xf32>
      %171 = tpu.matmul %45, %168, %cst_57 {dimension_numbers = #tpu.dot_dimension_numbers<[2], [2], [1], [1], [0, 0, 0, 1, 1, 1], [0], [0]>} : vector<4x8x8xbf16>, vector<4x8x8xbf16>, vector<4x8x8xf32> -> vector<4x8x8xf32>
      "tpu.trace_stop"() : () -> ()
      %172 = tpu.iota {dimensions = array<i32: 1>} : vector<8x8xi32>
      %173 = vector.broadcast %166 : i32 to vector<8x8xi32>
      %174 = arith.addi %173, %172 : vector<8x8xi32>
      %175 = arith.cmpi sle, %174, %74 : vector<8x8xi32>
      %176 = vector.shape_cast %175 : vector<8x8xi1> to vector<1x8x8xi1>
      %cst_58 = arith.constant 0xFF800000 : f32
      %177 = vector.shape_cast %176 : vector<1x8x8xi1> to vector<1x8x8xi1>
      %178 = vector.broadcast %177 : vector<1x8x8xi1> to vector<4x8x8xi1>
      %179 = vector.broadcast %cst_58 : f32 to vector<4x8x8xf32>
      %180 = arith.select %178, %171, %179 : vector<4x8x8xi1>, vector<4x8x8xf32>
      %cst_59 = arith.constant dense<0xFF800000> : vector<4x8xf32>
      %181 = vector.multi_reduction <maximumf>, %180, %cst_59 [2] : vector<4x8x8xf32> to vector<4x8xf32>
      %182 = vector.shape_cast %181 : vector<4x8xf32> to vector<4x8x1xf32>
      %183 = arith.maximumf %arg18, %182 : vector<4x8x1xf32>
      %184 = arith.subf %arg18, %183 : vector<4x8x1xf32>
      %185 = math.exp %184 : vector<4x8x1xf32>
      %186 = vector.broadcast %183 : vector<4x8x1xf32> to vector<4x8x8xf32>
      %187 = arith.subf %180, %186 : vector<4x8x8xf32>
      %188 = math.exp %187 : vector<4x8x8xf32>
      %189 = arith.mulf %185, %arg19 : vector<4x8x1xf32>
      %cst_60 = arith.constant dense<0.000000e+00> : vector<4x8xf32>
      %190 = vector.multi_reduction <add>, %188, %cst_60 [2] : vector<4x8x8xf32> to vector<4x8xf32>
      %191 = vector.shape_cast %190 : vector<4x8xf32> to vector<4x8x1xf32>
      %192 = arith.addf %189, %191 : vector<4x8x1xf32>
      %193 = vector.broadcast %185 : vector<4x8x1xf32> to vector<4x8x8xf32>
      %194 = arith.mulf %193, %arg20 : vector<4x8x8xf32>
      %195 = arith.truncf %188 : vector<4x8x8xf32> to vector<4x8x8xbf16>
      "tpu.trace_start"() <{level = 10 : i32, message = "hqk,hkd->hqd"}> : () -> ()
      %cst_61 = arith.constant dense<0.000000e+00> : vector<4x8x8xf32>
      %196 = tpu.matmul %195, %170, %cst_61 {dimension_numbers = #tpu.dot_dimension_numbers<[2], [1], [1], [2], [0, 0, 0, 1, 1, 2], [0], [0]>} : vector<4x8x8xbf16>, vector<4x8x8xbf16>, vector<4x8x8xf32> -> vector<4x8x8xf32>
      "tpu.trace_stop"() : () -> ()
      %197 = arith.addf %194, %196 : vector<4x8x8xf32>
      scf.yield %183, %192, %197 : vector<4x8x1xf32>, vector<4x8x1xf32>, vector<4x8x8xf32>
    }
    %82 = tpu.reciprocal %81#1 {approx = true} : vector<4x8x1xf32> -> vector<4x8x1xf32>
    %83 = vector.broadcast %82 : vector<4x8x1xf32> to vector<4x8x8xf32>
    %84 = arith.mulf %81#2, %83 : vector<4x8x8xf32>
    %85 = vector.extract_strided_slice %84 {offsets = [0, 0, 0], sizes = [1, 8, 8], strides = [1, 1, 1]} : vector<4x8x8xf32> to vector<1x8x8xf32>
    %86 = vector.shape_cast %85 : vector<1x8x8xf32> to vector<8x8xf32>
    %87 = vector.extract_strided_slice %84 {offsets = [1, 0, 0], sizes = [1, 8, 8], strides = [1, 1, 1]} : vector<4x8x8xf32> to vector<1x8x8xf32>
    %88 = vector.shape_cast %87 : vector<1x8x8xf32> to vector<8x8xf32>
    %89 = vector.extract_strided_slice %84 {offsets = [2, 0, 0], sizes = [1, 8, 8], strides = [1, 1, 1]} : vector<4x8x8xf32> to vector<1x8x8xf32>
    %90 = vector.shape_cast %89 : vector<1x8x8xf32> to vector<8x8xf32>
    %91 = vector.extract_strided_slice %84 {offsets = [3, 0, 0], sizes = [1, 8, 8], strides = [1, 1, 1]} : vector<4x8x8xf32> to vector<1x8x8xf32>
    %92 = vector.shape_cast %91 : vector<1x8x8xf32> to vector<8x8xf32>
    %93 = tpu.concatenate %86, %88, %90, %92 in 1 : vector<8x8xf32>, vector<8x8xf32>, vector<8x8xf32>, vector<8x8xf32> -> vector<8x32xf32>
    %94 = arith.truncf %93 : vector<8x32xf32> to vector<8x32xbf16>
    %c0_21 = arith.constant 0 : index
    %c0_22 = arith.constant 0 : index
    %95 = vector.load %arg4[%c0_21, %c0_22] : memref<32x32xbf16, #tpu.memory_space<vmem>>, vector<32x32xbf16>
    %cst_23 = arith.constant dense<0.000000e+00> : vector<8x32xf32>
    %96 = tpu.matmul %94, %95, %cst_23 {dimension_numbers = #tpu.dot_dimension_numbers<[1], [0], [0], [1], [0, 0, 1, 1], [], []>} : vector<8x32xbf16>, vector<32x32xbf16>, vector<8x32xf32> -> vector<8x32xf32>
    %97 = arith.addf %3, %96 : vector<8x32xf32>
    %c0_24 = arith.constant 0 : index
    %c0_25 = arith.constant 0 : index
    %98 = vector.load %arg5[%c0_24, %c0_25] : memref<1x32xf32, #tpu.memory_space<vmem>>, vector<1x32xf32>
    %99 = vector.shape_cast %98 : vector<1x32xf32> to vector<32xf32>
    %100 = vector.shape_cast %99 : vector<32xf32> to vector<1x32xf32>
    %101 = vector.broadcast %100 : vector<1x32xf32> to vector<8x32xf32>
    %102 = arith.addf %97, %101 : vector<8x32xf32>
    %c0_26 = arith.constant 0 : index
    %c0_27 = arith.constant 0 : index
    %103 = vector.load %arg8[%c0_26, %c0_27] : memref<1x32xf32, #tpu.memory_space<vmem>>, vector<1x32xf32>
    %104 = vector.shape_cast %103 : vector<1x32xf32> to vector<32xf32>
    %c0_28 = arith.constant 0 : index
    %c0_29 = arith.constant 0 : index
    %105 = vector.load %arg9[%c0_28, %c0_29] : memref<1x32xf32, #tpu.memory_space<vmem>>, vector<1x32xf32>
    %106 = vector.shape_cast %105 : vector<1x32xf32> to vector<32xf32>
    %cst_30 = arith.constant dense<0.000000e+00> : vector<8xf32>
    %107 = vector.multi_reduction <add>, %102, %cst_30 [1] : vector<8x32xf32> to vector<8xf32>
    %108 = vector.shape_cast %107 : vector<8xf32> to vector<8x1xf32>
    %cst_31 = arith.constant 3.200000e+01 : f32
    %109 = vector.broadcast %cst_31 : f32 to vector<8x1xf32>
    %110 = arith.divf %108, %109 : vector<8x1xf32>
    %111 = vector.broadcast %110 : vector<8x1xf32> to vector<8x32xf32>
    %112 = arith.subf %102, %111 : vector<8x32xf32>
    %113 = arith.mulf %112, %112 : vector<8x32xf32>
    %cst_32 = arith.constant dense<0.000000e+00> : vector<8xf32>
    %114 = vector.multi_reduction <add>, %113, %cst_32 [1] : vector<8x32xf32> to vector<8xf32>
    %115 = vector.shape_cast %114 : vector<8xf32> to vector<8x1xf32>
    %cst_33 = arith.constant 3.200000e+01 : f32
    %116 = vector.broadcast %cst_33 : f32 to vector<8x1xf32>
    %117 = arith.divf %115, %116 : vector<8x1xf32>
    %118 = vector.broadcast %110 : vector<8x1xf32> to vector<8x32xf32>
    %119 = arith.subf %102, %118 : vector<8x32xf32>
    %120 = vector.shape_cast %104 : vector<32xf32> to vector<1x32xf32>
    %121 = vector.broadcast %120 : vector<1x32xf32> to vector<8x32xf32>
    %122 = arith.mulf %121, %119 : vector<8x32xf32>
    %cst_34 = arith.constant 9.99999974E-6 : f32
    %123 = vector.broadcast %cst_34 : f32 to vector<8x1xf32>
    %124 = arith.addf %117, %123 : vector<8x1xf32>
    %125 = math.rsqrt %124 : vector<8x1xf32>
    %126 = vector.broadcast %125 : vector<8x1xf32> to vector<8x32xf32>
    %127 = arith.mulf %122, %126 : vector<8x32xf32>
    %128 = vector.shape_cast %106 : vector<32xf32> to vector<1x32xf32>
    %129 = vector.broadcast %128 : vector<1x32xf32> to vector<8x32xf32>
    %130 = arith.addf %127, %129 : vector<8x32xf32>
    %131 = arith.truncf %130 : vector<8x32xf32> to vector<8x32xbf16>
    %c0_35 = arith.constant 0 : index
    %c0_36 = arith.constant 0 : index
    %132 = vector.load %arg10[%c0_35, %c0_36] : memref<32x128xbf16, #tpu.memory_space<vmem>>, vector<32x128xbf16>
    %cst_37 = arith.constant dense<0.000000e+00> : vector<8x128xf32>
    %133 = tpu.matmul %131, %132, %cst_37 {dimension_numbers = #tpu.dot_dimension_numbers<[1], [0], [0], [1], [0, 0, 1, 1], [], []>} : vector<8x32xbf16>, vector<32x128xbf16>, vector<8x128xf32> -> vector<8x128xf32>
    %c0_38 = arith.constant 0 : index
    %c0_39 = arith.constant 0 : index
    %134 = vector.load %arg11[%c0_38, %c0_39] : memref<1x128xf32, #tpu.memory_space<vmem>>, vector<1x128xf32>
    %135 = vector.shape_cast %134 : vector<1x128xf32> to vector<128xf32>
    %136 = vector.shape_cast %135 : vector<128xf32> to vector<1x128xf32>
    %137 = vector.broadcast %136 : vector<1x128xf32> to vector<8x128xf32>
    %138 = arith.addf %133, %137 : vector<8x128xf32>
    %cst_40 = arith.constant 5.000000e-01 : f32
    %139 = vector.broadcast %cst_40 : f32 to vector<8x128xf32>
    %140 = arith.mulf %139, %138 : vector<8x128xf32>
    %cst_41 = arith.constant 0.636619746 : f32
    %141 = math.sqrt %cst_41 : f32
    %142 = arith.mulf %138, %138 : vector<8x128xf32>
    %143 = arith.mulf %138, %142 : vector<8x128xf32>
    %cst_42 = arith.constant 4.471500e-02 : f32
    %144 = vector.broadcast %cst_42 : f32 to vector<8x128xf32>
    %145 = arith.mulf %144, %143 : vector<8x128xf32>
    %146 = arith.addf %138, %145 : vector<8x128xf32>
    %147 = vector.broadcast %141 : f32 to vector<8x128xf32>
    %148 = arith.mulf %147, %146 : vector<8x128xf32>
    %149 = math.tanh %148 : vector<8x128xf32>
    %cst_43 = arith.constant 1.000000e+00 : f32
    %150 = vector.broadcast %cst_43 : f32 to vector<8x128xf32>
    %151 = arith.addf %150, %149 : vector<8x128xf32>
    %152 = arith.mulf %140, %151 : vector<8x128xf32>
    %153 = arith.truncf %152 : vector<8x128xf32> to vector<8x128xbf16>
    %c0_44 = arith.constant 0 : index
    %c0_45 = arith.constant 0 : index
    %154 = vector.load %arg12[%c0_44, %c0_45] : memref<128x32xbf16, #tpu.memory_space<vmem>>, vector<128x32xbf16>
    %cst_46 = arith.constant dense<0.000000e+00> : vector<8x32xf32>
    %155 = tpu.matmul %153, %154, %cst_46 {dimension_numbers = #tpu.dot_dimension_numbers<[1], [0], [0], [1], [0, 0, 1, 1], [], []>} : vector<8x128xbf16>, vector<128x32xbf16>, vector<8x32xf32> -> vector<8x32xf32>
    %c0_47 = arith.constant 0 : index
    %c0_48 = arith.constant 0 : index
    %156 = vector.load %arg13[%c0_47, %c0_48] : memref<1x32xf32, #tpu.memory_space<vmem>>, vector<1x32xf32>
    %157 = vector.shape_cast %156 : vector<1x32xf32> to vector<32xf32>
    %158 = vector.shape_cast %157 : vector<32xf32> to vector<1x32xf32>
    %159 = vector.broadcast %158 : vector<1x32xf32> to vector<8x32xf32>
    %160 = arith.addf %155, %159 : vector<8x32xf32>
    %161 = arith.addf %102, %160 : vector<8x32xf32>
    %c0_49 = arith.constant 0 : index
    %c0_50 = arith.constant 0 : index
    %c0_51 = arith.constant 0 : index
    %162 = vector.load %arg14[%c0_49, %c0_50, %c0_51] : memref<1x8x32xf32, #tpu.memory_space<vmem>>, vector<1x8x32xf32>
    %163 = vector.shape_cast %162 : vector<1x8x32xf32> to vector<8x32xf32>
    %164 = vector.shape_cast %161 : vector<8x32xf32> to vector<1x8x32xf32>
    tpu.vector_store %arg14[%c0_49, %c0_50, %c0_51], %164 {strides = array<i32>} : memref<1x8x32xf32, #tpu.memory_space<vmem>>, vector<1x8x32xf32>,
    return
  }
  func.func @transform_0(%arg0: i32, %arg1: i32) -> (i32, i32, i32) {
    %c0_i32 = arith.constant 0 : i32
    %c0_i32_0 = arith.constant 0 : i32
    return %arg0, %arg1, %c0_i32 : i32, i32, i32
  }
  func.func @transform_1(%arg0: i32, %arg1: i32) -> (i32, i32) {
    %c0_i32 = arith.constant 0 : i32
    %c0_i32_0 = arith.constant 0 : i32
    %c0_i32_1 = arith.constant 0 : i32
    return %c0_i32, %c0_i32_0 : i32, i32
  }
  func.func @transform_2(%arg0: i32, %arg1: i32) -> (i32, i32) {
    %c0_i32 = arith.constant 0 : i32
    %c0_i32_0 = arith.constant 0 : i32
    %c0_i32_1 = arith.constant 0 : i32
    return %c0_i32, %c0_i32_0 : i32, i32
  }
  func.func @transform_3(%arg0: i32, %arg1: i32) -> (i32, i32) {
    %c0_i32 = arith.constant 0 : i32
    %c0_i32_0 = arith.constant 0 : i32
    %c0_i32_1 = arith.constant 0 : i32
    return %c0_i32, %c0_i32_0 : i32, i32
  }
  func.func @transform_4(%arg0: i32, %arg1: i32) -> (i32, i32) {
    %c0_i32 = arith.constant 0 : i32
    %c0_i32_0 = arith.constant 0 : i32
    %c0_i32_1 = arith.constant 0 : i32
    return %c0_i32, %c0_i32_0 : i32, i32
  }
  func.func @transform_5(%arg0: i32, %arg1: i32) -> (i32, i32) {
    %c0_i32 = arith.constant 0 : i32
    %c0_i32_0 = arith.constant 0 : i32
    %c0_i32_1 = arith.constant 0 : i32
    return %c0_i32, %c0_i32_0 : i32, i32
  }
  func.func @transform_6(%arg0: i32, %arg1: i32) -> (i32, i32) {
    %c0_i32 = arith.constant 0 : i32
    %c0_i32_0 = arith.constant 0 : i32
    %c0_i32_1 = arith.constant 0 : i32
    return %c0_i32, %c0_i32_0 : i32, i32
  }
  func.func @transform_7(%arg0: i32, %arg1: i32) -> (i32, i32) {
    %c0_i32 = arith.constant 0 : i32
    %c0_i32_0 = arith.constant 0 : i32
    %c0_i32_1 = arith.constant 0 : i32
    return %c0_i32, %c0_i32_0 : i32, i32
  }
  func.func @transform_8(%arg0: i32, %arg1: i32) -> (i32, i32) {
    %c0_i32 = arith.constant 0 : i32
    %c0_i32_0 = arith.constant 0 : i32
    %c0_i32_1 = arith.constant 0 : i32
    return %c0_i32, %c0_i32_0 : i32, i32
  }
  func.func @transform_9(%arg0: i32, %arg1: i32) -> (i32, i32) {
    %c0_i32 = arith.constant 0 : i32
    %c0_i32_0 = arith.constant 0 : i32
    %c0_i32_1 = arith.constant 0 : i32
    return %c0_i32, %c0_i32_0 : i32, i32
  }
  func.func @transform_10(%arg0: i32, %arg1: i32) -> (i32, i32) {
    %c0_i32 = arith.constant 0 : i32
    %c0_i32_0 = arith.constant 0 : i32
    %c0_i32_1 = arith.constant 0 : i32
    return %c0_i32, %c0_i32_0 : i32, i32
  }
  func.func @transform_11(%arg0: i32, %arg1: i32) -> (i32, i32) {
    %c0_i32 = arith.constant 0 : i32
    %c0_i32_0 = arith.constant 0 : i32
    %c0_i32_1 = arith.constant 0 : i32
    return %c0_i32, %c0_i32_0 : i32, i32
  }
  func.func @transform_12(%arg0: i32, %arg1: i32) -> (i32, i32, i32) {
    %c0_i32 = arith.constant 0 : i32
    %c0_i32_0 = arith.constant 0 : i32
    return %arg0, %arg1, %c0_i32 : i32, i32, i32
  }
}

module attributes {stable_mosaic.version = 11 : i64} {
  func.func @transformer_block_kernel(%arg0: i32, %arg1: i32, %arg2: memref<1x8x32xf32, #tpu.memory_space<vmem>>, %arg3: memref<32x96xbf16, #tpu.memory_space<vmem>>, %arg4: memref<32x32xbf16, #tpu.memory_space<vmem>>, %arg5: memref<1x32xf32, #tpu.memory_space<vmem>>, %arg6: memref<1x32xf32, #tpu.memory_space<vmem>>, %arg7: memref<1x32xf32, #tpu.memory_space<vmem>>, %arg8: memref<1x32xf32, #tpu.memory_space<vmem>>, %arg9: memref<1x32xf32, #tpu.memory_space<vmem>>, %arg10: memref<32x128xbf16, #tpu.memory_space<vmem>>, %arg11: memref<1x128xf32, #tpu.memory_space<vmem>>, %arg12: memref<128x32xbf16, #tpu.memory_space<vmem>>, %arg13: memref<1x32xf32, #tpu.memory_space<vmem>>, %arg14: memref<1x8x32xf32, #tpu.memory_space<vmem>>, %arg15: memref<4x8x8xbf16, #tpu.memory_space<vmem>>, %arg16: memref<4x8x8xbf16, #tpu.memory_space<vmem>>) attributes {dimension_semantics = [#tpu.dimension_semantics<parallel>, #tpu.dimension_semantics<arbitrary>], iteration_bounds = array<i64: 2, 1>, scalar_prefetch = 0 : i64, scratch_operands = 2 : i64, tpu.core_type = #tpu.core_type<tc>, window_params = [{transform_indices = @transform_0, window_bounds = array<i64: 1, 8, 32>}, {pipeline_mode = #tpu.pipeline_mode<synchronous>, transform_indices = @transform_1, window_bounds = array<i64: 32, 96>}, {pipeline_mode = #tpu.pipeline_mode<synchronous>, transform_indices = @transform_2, window_bounds = array<i64: 32, 32>}, {pipeline_mode = #tpu.pipeline_mode<synchronous>, transform_indices = @transform_3, window_bounds = array<i64: 1, 32>}, {pipeline_mode = #tpu.pipeline_mode<synchronous>, transform_indices = @transform_4, window_bounds = array<i64: 1, 32>}, {pipeline_mode = #tpu.pipeline_mode<synchronous>, transform_indices = @transform_5, window_bounds = array<i64: 1, 32>}, {pipeline_mode = #tpu.pipeline_mode<synchronous>, transform_indices = @transform_6, window_bounds = array<i64: 1, 32>}, {pipeline_mode = #tpu.pipeline_mode<synchronous>, transform_indices = @transform_7, window_bounds = array<i64: 1, 32>}, {pipeline_mode = #tpu.pipeline_mode<synchronous>, transform_indices = @transform_8, window_bounds = array<i64: 32, 128>}, {pipeline_mode = #tpu.pipeline_mode<synchronous>, transform_indices = @transform_9, window_bounds = array<i64: 1, 128>}, {pipeline_mode = #tpu.pipeline_mode<synchronous>, transform_indices = @transform_10, window_bounds = array<i64: 128, 32>}, {pipeline_mode = #tpu.pipeline_mode<synchronous>, transform_indices = @transform_11, window_bounds = array<i64: 1, 32>}, {transform_indices = @transform_12, window_bounds = array<i64: 1, 8, 32>}]} {
    %c8_i32 = arith.constant 8 : i32
    %0 = arith.muli %arg1, %c8_i32 : i32
    %1 = tpu.assume_multiple %0, 8 : i32
    %c0 = arith.constant 0 : index
    %c0_0 = arith.constant 0 : index
    %c0_1 = arith.constant 0 : index
    %2 = vector.load %arg2[%c0, %c0_0, %c0_1] : memref<1x8x32xf32, #tpu.memory_space<vmem>>, vector<1x8x32xf32>
    %3 = vector.shape_cast %2 : vector<1x8x32xf32> to vector<8x32xf32>
    %c0_2 = arith.constant 0 : index
    %c0_3 = arith.constant 0 : index
    %4 = vector.load %arg6[%c0_2, %c0_3] : memref<1x32xf32, #tpu.memory_space<vmem>>, vector<1x32xf32>
    %5 = vector.shape_cast %4 : vector<1x32xf32> to vector<32xf32>
    %c0_4 = arith.constant 0 : index
    %c0_5 = arith.constant 0 : index
    %6 = vector.load %arg7[%c0_4, %c0_5] : memref<1x32xf32, #tpu.memory_space<vmem>>, vector<1x32xf32>
    %7 = vector.shape_cast %6 : vector<1x32xf32> to vector<32xf32>
    %cst = arith.constant dense<0.000000e+00> : vector<8xf32>
    %8 = vector.multi_reduction <add>, %3, %cst [1] : vector<8x32xf32> to vector<8xf32>
    %9 = vector.shape_cast %8 : vector<8xf32> to vector<8x1xf32>
    %cst_6 = arith.constant 3.200000e+01 : f32
    %10 = vector.broadcast %cst_6 : f32 to vector<8x1xf32>
    %11 = arith.divf %9, %10 : vector<8x1xf32>
    %12 = vector.broadcast %11 : vector<8x1xf32> to vector<8x32xf32>
    %13 = arith.subf %3, %12 : vector<8x32xf32>
    %14 = arith.mulf %13, %13 : vector<8x32xf32>
    %cst_7 = arith.constant dense<0.000000e+00> : vector<8xf32>
    %15 = vector.multi_reduction <add>, %14, %cst_7 [1] : vector<8x32xf32> to vector<8xf32>
    %16 = vector.shape_cast %15 : vector<8xf32> to vector<8x1xf32>
    %cst_8 = arith.constant 3.200000e+01 : f32
    %17 = vector.broadcast %cst_8 : f32 to vector<8x1xf32>
    %18 = arith.divf %16, %17 : vector<8x1xf32>
    %19 = vector.broadcast %11 : vector<8x1xf32> to vector<8x32xf32>
    %20 = arith.subf %3, %19 : vector<8x32xf32>
    %21 = vector.shape_cast %5 : vector<32xf32> to vector<1x32xf32>
    %22 = vector.broadcast %21 : vector<1x32xf32> to vector<8x32xf32>
    %23 = arith.mulf %22, %20 : vector<8x32xf32>
    %cst_9 = arith.constant 9.99999974E-6 : f32
    %24 = vector.broadcast %cst_9 : f32 to vector<8x1xf32>
    %25 = arith.addf %18, %24 : vector<8x1xf32>
    %26 = math.rsqrt %25 : vector<8x1xf32>
    %27 = vector.broadcast %26 : vector<8x1xf32> to vector<8x32xf32>
    %28 = arith.mulf %23, %27 : vector<8x32xf32>
    %29 = vector.shape_cast %7 : vector<32xf32> to vector<1x32xf32>
    %30 = vector.broadcast %29 : vector<1x32xf32> to vector<8x32xf32>
    %31 = arith.addf %28, %30 : vector<8x32xf32>
    %32 = arith.truncf %31 : vector<8x32xf32> to vector<8x32xbf16>
    %c0_10 = arith.constant 0 : index
    %c0_11 = arith.constant 0 : index
    %33 = vector.load %arg3[%c0_10, %c0_11] : memref<32x96xbf16, #tpu.memory_space<vmem>>, vector<32x96xbf16>
    %cst_12 = arith.constant dense<0.000000e+00> : vector<8x96xf32>
    %34 = tpu.matmul %32, %33, %cst_12 {dimension_numbers = #tpu.dot_dimension_numbers<[1], [0], [0], [1], [0, 0, 1, 1], [], []>} : vector<8x32xbf16>, vector<32x96xbf16>, vector<8x96xf32> -> vector<8x96xf32>
    %35 = vector.extract_strided_slice %34 {offsets = [0, 0], sizes = [8, 32], strides = [1, 1]} : vector<8x96xf32> to vector<8x32xf32>
    %36 = vector.extract_strided_slice %35 {offsets = [0, 0], sizes = [8, 8], strides = [1, 1]} : vector<8x32xf32> to vector<8x8xf32>
    %37 = vector.extract_strided_slice %35 {offsets = [0, 8], sizes = [8, 8], strides = [1, 1]} : vector<8x32xf32> to vector<8x8xf32>
    %38 = vector.extract_strided_slice %35 {offsets = [0, 16], sizes = [8, 8], strides = [1, 1]} : vector<8x32xf32> to vector<8x8xf32>
    %39 = vector.extract_strided_slice %35 {offsets = [0, 24], sizes = [8, 8], strides = [1, 1]} : vector<8x32xf32> to vector<8x8xf32>
    %40 = vector.shape_cast %36 : vector<8x8xf32> to vector<1x8x8xf32>
    %41 = vector.shape_cast %37 : vector<8x8xf32> to vector<1x8x8xf32>
    %42 = vector.shape_cast %38 : vector<8x8xf32> to vector<1x8x8xf32>
    %43 = vector.shape_cast %39 : vector<8x8xf32> to vector<1x8x8xf32>
    %44 = tpu.concatenate %40, %41, %42, %43 in 0 : vector<1x8x8xf32>, vector<1x8x8xf32>, vector<1x8x8xf32>, vector<1x8x8xf32> -> vector<4x8x8xf32>
    %45 = arith.truncf %44 : vector<4x8x8xf32> to vector<4x8x8xbf16>
    %46 = vector.extract_strided_slice %34 {offsets = [0, 32], sizes = [8, 32], strides = [1, 1]} : vector<8x96xf32> to vector<8x32xf32>
    %47 = vector.extract_strided_slice %46 {offsets = [0, 0], sizes = [8, 8], strides = [1, 1]} : vector<8x32xf32> to vector<8x8xf32>
    %48 = vector.extract_strided_slice %46 {offsets = [0, 8], sizes = [8, 8], strides = [1, 1]} : vector<8x32xf32> to vector<8x8xf32>
    %49 = vector.extract_strided_slice %46 {offsets = [0, 16], sizes = [8, 8], strides = [1, 1]} : vector<8x32xf32> to vector<8x8xf32>
    %50 = vector.extract_strided_slice %46 {offsets = [0, 24], sizes = [8, 8], strides = [1, 1]} : vector<8x32xf32> to vector<8x8xf32>
    %51 = vector.shape_cast %47 : vector<8x8xf32> to vector<1x8x8xf32>
    %52 = vector.shape_cast %48 : vector<8x8xf32> to vector<1x8x8xf32>
    %53 = vector.shape_cast %49 : vector<8x8xf32> to vector<1x8x8xf32>
    %54 = vector.shape_cast %50 : vector<8x8xf32> to vector<1x8x8xf32>
    %55 = tpu.concatenate %51, %52, %53, %54 in 0 : vector<1x8x8xf32>, vector<1x8x8xf32>, vector<1x8x8xf32>, vector<1x8x8xf32> -> vector<4x8x8xf32>
    %56 = arith.truncf %55 : vector<4x8x8xf32> to vector<4x8x8xbf16>
    %57 = vector.extract_strided_slice %34 {offsets = [0, 64], sizes = [8, 32], strides = [1, 1]} : vector<8x96xf32> to vector<8x32xf32>
    %58 = vector.extract_strided_slice %57 {offsets = [0, 0], sizes = [8, 8], strides = [1, 1]} : vector<8x32xf32> to vector<8x8xf32>
    %59 = vector.extract_strided_slice %57 {offsets = [0, 8], sizes = [8, 8], strides = [1, 1]} : vector<8x32xf32> to vector<8x8xf32>
    %60 = vector.extract_strided_slice %57 {offsets = [0, 16], sizes = [8, 8], strides = [1, 1]} : vector<8x32xf32> to vector<8x8xf32>
    %61 = vector.extract_strided_slice %57 {offsets = [0, 24], sizes = [8, 8], strides = [1, 1]} : vector<8x32xf32> to vector<8x8xf32>
    %62 = vector.shape_cast %58 : vector<8x8xf32> to vector<1x8x8xf32>
    %63 = vector.shape_cast %59 : vector<8x8xf32> to vector<1x8x8xf32>
    %64 = vector.shape_cast %60 : vector<8x8xf32> to vector<1x8x8xf32>
    %65 = vector.shape_cast %61 : vector<8x8xf32> to vector<1x8x8xf32>
    %66 = tpu.concatenate %62, %63, %64, %65 in 0 : vector<1x8x8xf32>, vector<1x8x8xf32>, vector<1x8x8xf32>, vector<1x8x8xf32> -> vector<4x8x8xf32>
    %67 = arith.truncf %66 : vector<4x8x8xf32> to vector<4x8x8xbf16>
    %c0_13 = arith.constant 0 : index
    %68 = arith.index_cast %1 : i32 to index
    %c0_14 = arith.constant 0 : index
    %69 = vector.load %arg15[%c0_13, %68, %c0_14] : memref<4x8x8xbf16, #tpu.memory_space<vmem>>, vector<4x8x8xbf16>
    tpu.vector_store %arg15[%c0_13, %68, %c0_14], %56 {strides = array<i32>} : memref<4x8x8xbf16, #tpu.memory_space<vmem>>, vector<4x8x8xbf16>,
    %c0_15 = arith.constant 0 : index
    %70 = arith.index_cast %1 : i32 to index
    %c0_16 = arith.constant 0 : index
    %71 = vector.load %arg16[%c0_15, %70, %c0_16] : memref<4x8x8xbf16, #tpu.memory_space<vmem>>, vector<4x8x8xbf16>
    tpu.vector_store %arg16[%c0_15, %70, %c0_16], %67 {strides = array<i32>} : memref<4x8x8xbf16, #tpu.memory_space<vmem>>, vector<4x8x8xbf16>,
    %72 = tpu.iota {dimensions = array<i32: 0>} : vector<8x8xi32>
    %73 = vector.broadcast %1 : i32 to vector<8x8xi32>
    %74 = arith.addi %73, %72 : vector<8x8xi32>
    %cst_17 = arith.constant 0xFF800000 : f32
    %75 = vector.broadcast %cst_17 : f32 to vector<4x8x1xf32>
    %cst_18 = arith.constant 0.000000e+00 : f32
    %76 = vector.broadcast %cst_18 : f32 to vector<4x8x1xf32>
    %cst_19 = arith.constant 0.000000e+00 : f32
    %77 = vector.broadcast %cst_19 : f32 to vector<4x8x8xf32>
    %c1_i32 = arith.constant 1 : i32
    %78 = arith.addi %arg1, %c1_i32 : i32
    %c0_i32 = arith.constant 0 : i32
    %79 = arith.subi %78, %c0_i32 : i32
    %80 = arith.addi %c0_i32, %79 : i32
    %c1_i32_20 = arith.constant 1 : i32
    %81:3 = scf.for %arg17 = %c0_i32 to %80 step %c1_i32_20 iter_args(%arg18 = %75, %arg19 = %76, %arg20 = %77) -> (vector<4x8x1xf32>, vector<4x8x1xf32>, vector<4x8x8xf32>)  : i32 {
      %c8_i32_52 = arith.constant 8 : i32
      %165 = arith.muli %arg17, %c8_i32_52 : i32
      %166 = tpu.assume_multiple %165, 8 : i32
      %c0_53 = arith.constant 0 : index
      %167 = arith.index_cast %166 : i32 to index
      %c0_54 = arith.constant 0 : index
      %168 = vector.load %arg15[%c0_53, %167, %c0_54] : memref<4x8x8xbf16, #tpu.memory_space<vmem>>, vector<4x8x8xbf16>
      %c0_55 = arith.constant 0 : index
      %169 = arith.index_cast %166 : i32 to index
      %c0_56 = arith.constant 0 : index
      %170 = vector.load %arg16[%c0_55, %169, %c0_56] : memref<4x8x8xbf16, #tpu.memory_space<vmem>>, vector<4x8x8xbf16>
      "tpu.trace_start"() <{level = 10 : i32, message = "hqd,hkd->hqk"}> : () -> ()
      %cst_57 = arith.constant dense<0.000000e+00> : vector<4x8x8xf32>
      %171 = tpu.matmul %45, %168, %cst_57 {dimension_numbers = #tpu.dot_dimension_numbers<[2], [2], [1], [1], [0, 0, 0, 1, 1, 1], [0], [0]>} : vector<4x8x8xbf16>, vector<4x8x8xbf16>, vector<4x8x8xf32> -> vector<4x8x8xf32>
      "tpu.trace_stop"() : () -> ()
      %172 = tpu.iota {dimensions = array<i32: 1>} : vector<8x8xi32>
      %173 = vector.broadcast %166 : i32 to vector<8x8xi32>
      %174 = arith.addi %173, %172 : vector<8x8xi32>
      %175 = arith.cmpi sle, %174, %74 : vector<8x8xi32>
      %176 = vector.shape_cast %175 : vector<8x8xi1> to vector<1x8x8xi1>
      %cst_58 = arith.constant 0xFF800000 : f32
      %177 = vector.shape_cast %176 : vector<1x8x8xi1> to vector<1x8x8xi1>
      %178 = vector.broadcast %177 : vector<1x8x8xi1> to vector<4x8x8xi1>
      %179 = vector.broadcast %cst_58 : f32 to vector<4x8x8xf32>
      %180 = arith.select %178, %171, %179 : vector<4x8x8xi1>, vector<4x8x8xf32>
      %cst_59 = arith.constant dense<0xFF800000> : vector<4x8xf32>
      %181 = vector.multi_reduction <maximumf>, %180, %cst_59 [2] : vector<4x8x8xf32> to vector<4x8xf32>
      %182 = vector.shape_cast %181 : vector<4x8xf32> to vector<4x8x1xf32>
      %183 = arith.maximumf %arg18, %182 : vector<4x8x1xf32>
      %184 = arith.subf %arg18, %183 : vector<4x8x1xf32>
      %185 = math.exp %184 : vector<4x8x1xf32>
      %186 = vector.broadcast %183 : vector<4x8x1xf32> to vector<4x8x8xf32>
      %187 = arith.subf %180, %186 : vector<4x8x8xf32>
      %188 = math.exp %187 : vector<4x8x8xf32>
      %189 = arith.mulf %185, %arg19 : vector<4x8x1xf32>
      %cst_60 = arith.constant dense<0.000000e+00> : vector<4x8xf32>
      %190 = vector.multi_reduction <add>, %188, %cst_60 [2] : vector<4x8x8xf32> to vector<4x8xf32>
      %191 = vector.shape_cast %190 : vector<4x8xf32> to vector<4x8x1xf32>
      %192 = arith.addf %189, %191 : vector<4x8x1xf32>
      %193 = vector.broadcast %185 : vector<4x8x1xf32> to vector<4x8x8xf32>
      %194 = arith.mulf %193, %arg20 : vector<4x8x8xf32>
      %195 = arith.truncf %188 : vector<4x8x8xf32> to vector<4x8x8xbf16>
      "tpu.trace_start"() <{level = 10 : i32, message = "hqk,hkd->hqd"}> : () -> ()
      %cst_61 = arith.constant dense<0.000000e+00> : vector<4x8x8xf32>
      %196 = tpu.matmul %195, %170, %cst_61 {dimension_numbers = #tpu.dot_dimension_numbers<[2], [1], [1], [2], [0, 0, 0, 1, 1, 2], [0], [0]>} : vector<4x8x8xbf16>, vector<4x8x8xbf16>, vector<4x8x8xf32> -> vector<4x8x8xf32>
      "tpu.trace_stop"() : () -> ()
      %197 = arith.addf %194, %196 : vector<4x8x8xf32>
      scf.yield %183, %192, %197 : vector<4x8x1xf32>, vector<4x8x1xf32>, vector<4x8x8xf32>
    }
    %82 = tpu.reciprocal %81#1 {approx = true} : vector<4x8x1xf32> -> vector<4x8x1xf32>
    %83 = vector.broadcast %82 : vector<4x8x1xf32> to vector<4x8x8xf32>
    %84 = arith.mulf %81#2, %83 : vector<4x8x8xf32>
    %85 = vector.extract_strided_slice %84 {offsets = [0, 0, 0], sizes = [1, 8, 8], strides = [1, 1, 1]} : vector<4x8x8xf32> to vector<1x8x8xf32>
    %86 = vector.shape_cast %85 : vector<1x8x8xf32> to vector<8x8xf32>
    %87 = vector.extract_strided_slice %84 {offsets = [1, 0, 0], sizes = [1, 8, 8], strides = [1, 1, 1]} : vector<4x8x8xf32> to vector<1x8x8xf32>
    %88 = vector.shape_cast %87 : vector<1x8x8xf32> to vector<8x8xf32>
    %89 = vector.extract_strided_slice %84 {offsets = [2, 0, 0], sizes = [1, 8, 8], strides = [1, 1, 1]} : vector<4x8x8xf32> to vector<1x8x8xf32>
    %90 = vector.shape_cast %89 : vector<1x8x8xf32> to vector<8x8xf32>
    %91 = vector.extract_strided_slice %84 {offsets = [3, 0, 0], sizes = [1, 8, 8], strides = [1, 1, 1]} : vector<4x8x8xf32> to vector<1x8x8xf32>
    %92 = vector.shape_cast %91 : vector<1x8x8xf32> to vector<8x8xf32>
    %93 = tpu.concatenate %86, %88, %90, %92 in 1 : vector<8x8xf32>, vector<8x8xf32>, vector<8x8xf32>, vector<8x8xf32> -> vector<8x32xf32>
    %94 = arith.truncf %93 : vector<8x32xf32> to vector<8x32xbf16>
    %c0_21 = arith.constant 0 : index
    %c0_22 = arith.constant 0 : index
    %95 = vector.load %arg4[%c0_21, %c0_22] : memref<32x32xbf16, #tpu.memory_space<vmem>>, vector<32x32xbf16>
    %cst_23 = arith.constant dense<0.000000e+00> : vector<8x32xf32>
    %96 = tpu.matmul %94, %95, %cst_23 {dimension_numbers = #tpu.dot_dimension_numbers<[1], [0], [0], [1], [0, 0, 1, 1], [], []>} : vector<8x32xbf16>, vector<32x32xbf16>, vector<8x32xf32> -> vector<8x32xf32>
    %97 = arith.addf %3, %96 : vector<8x32xf32>
    %c0_24 = arith.constant 0 : index
    %c0_25 = arith.constant 0 : index
    %98 = vector.load %arg5[%c0_24, %c0_25] : memref<1x32xf32, #tpu.memory_space<vmem>>, vector<1x32xf32>
    %99 = vector.shape_cast %98 : vector<1x32xf32> to vector<32xf32>
    %100 = vector.shape_cast %99 : vector<32xf32> to vector<1x32xf32>
    %101 = vector.broadcast %100 : vector<1x32xf32> to vector<8x32xf32>
    %102 = arith.addf %97, %101 : vector<8x32xf32>
    %c0_26 = arith.constant 0 : index
    %c0_27 = arith.constant 0 : index
    %103 = vector.load %arg8[%c0_26, %c0_27] : memref<1x32xf32, #tpu.memory_space<vmem>>, vector<1x32xf32>
    %104 = vector.shape_cast %103 : vector<1x32xf32> to vector<32xf32>
    %c0_28 = arith.constant 0 : index
    %c0_29 = arith.constant 0 : index
    %105 = vector.load %arg9[%c0_28, %c0_29] : memref<1x32xf32, #tpu.memory_space<vmem>>, vector<1x32xf32>
    %106 = vector.shape_cast %105 : vector<1x32xf32> to vector<32xf32>
    %cst_30 = arith.constant dense<0.000000e+00> : vector<8xf32>
    %107 = vector.multi_reduction <add>, %102, %cst_30 [1] : vector<8x32xf32> to vector<8xf32>
    %108 = vector.shape_cast %107 : vector<8xf32> to vector<8x1xf32>
    %cst_31 = arith.constant 3.200000e+01 : f32
    %109 = vector.broadcast %cst_31 : f32 to vector<8x1xf32>
    %110 = arith.divf %108, %109 : vector<8x1xf32>
    %111 = vector.broadcast %110 : vector<8x1xf32> to vector<8x32xf32>
    %112 = arith.subf %102, %111 : vector<8x32xf32>
    %113 = arith.mulf %112, %112 : vector<8x32xf32>
    %cst_32 = arith.constant dense<0.000000e+00> : vector<8xf32>
    %114 = vector.multi_reduction <add>, %113, %cst_32 [1] : vector<8x32xf32> to vector<8xf32>
    %115 = vector.shape_cast %114 : vector<8xf32> to vector<8x1xf32>
    %cst_33 = arith.constant 3.200000e+01 : f32
    %116 = vector.broadcast %cst_33 : f32 to vector<8x1xf32>
    %117 = arith.divf %115, %116 : vector<8x1xf32>
    %118 = vector.broadcast %110 : vector<8x1xf32> to vector<8x32xf32>
    %119 = arith.subf %102, %118 : vector<8x32xf32>
    %120 = vector.shape_cast %104 : vector<32xf32> to vector<1x32xf32>
    %121 = vector.broadcast %120 : vector<1x32xf32> to vector<8x32xf32>
    %122 = arith.mulf %121, %119 : vector<8x32xf32>
    %cst_34 = arith.constant 9.99999974E-6 : f32
    %123 = vector.broadcast %cst_34 : f32 to vector<8x1xf32>
    %124 = arith.addf %117, %123 : vector<8x1xf32>
    %125 = math.rsqrt %124 : vector<8x1xf32>
    %126 = vector.broadcast %125 : vector<8x1xf32> to vector<8x32xf32>
    %127 = arith.mulf %122, %126 : vector<8x32xf32>
    %128 = vector.shape_cast %106 : vector<32xf32> to vector<1x32xf32>
    %129 = vector.broadcast %128 : vector<1x32xf32> to vector<8x32xf32>
    %130 = arith.addf %127, %129 : vector<8x32xf32>
    %131 = arith.truncf %130 : vector<8x32xf32> to vector<8x32xbf16>
    %c0_35 = arith.constant 0 : index
    %c0_36 = arith.constant 0 : index
    %132 = vector.load %arg10[%c0_35, %c0_36] : memref<32x128xbf16, #tpu.memory_space<vmem>>, vector<32x128xbf16>
    %cst_37 = arith.constant dense<0.000000e+00> : vector<8x128xf32>
    %133 = tpu.matmul %131, %132, %cst_37 {dimension_numbers = #tpu.dot_dimension_numbers<[1], [0], [0], [1], [0, 0, 1, 1], [], []>} : vector<8x32xbf16>, vector<32x128xbf16>, vector<8x128xf32> -> vector<8x128xf32>
    %c0_38 = arith.constant 0 : index
    %c0_39 = arith.constant 0 : index
    %134 = vector.load %arg11[%c0_38, %c0_39] : memref<1x128xf32, #tpu.memory_space<vmem>>, vector<1x128xf32>
    %135 = vector.shape_cast %134 : vector<1x128xf32> to vector<128xf32>
    %136 = vector.shape_cast %135 : vector<128xf32> to vector<1x128xf32>
    %137 = vector.broadcast %136 : vector<1x128xf32> to vector<8x128xf32>
    %138 = arith.addf %133, %137 : vector<8x128xf32>
    %cst_40 = arith.constant 5.000000e-01 : f32
    %139 = vector.broadcast %cst_40 : f32 to vector<8x128xf32>
    %140 = arith.mulf %139, %138 : vector<8x128xf32>
    %cst_41 = arith.constant 0.636619746 : f32
    %141 = math.sqrt %cst_41 : f32
    %142 = arith.mulf %138, %138 : vector<8x128xf32>
    %143 = arith.mulf %138, %142 : vector<8x128xf32>
    %cst_42 = arith.constant 4.471500e-02 : f32
    %144 = vector.broadcast %cst_42 : f32 to vector<8x128xf32>
    %145 = arith.mulf %144, %143 : vector<8x128xf32>
    %146 = arith.addf %138, %145 : vector<8x128xf32>
    %147 = vector.broadcast %141 : f32 to vector<8x128xf32>
    %148 = arith.mulf %147, %146 : vector<8x128xf32>
    %149 = math.tanh %148 : vector<8x128xf32>
    %cst_43 = arith.constant 1.000000e+00 : f32
    %150 = vector.broadcast %cst_43 : f32 to vector<8x128xf32>
    %151 = arith.addf %150, %149 : vector<8x128xf32>
    %152 = arith.mulf %140, %151 : vector<8x128xf32>
    %153 = arith.truncf %152 : vector<8x128xf32> to vector<8x128xbf16>
    %c0_44 = arith.constant 0 : index
    %c0_45 = arith.constant 0 : index
    %154 = vector.load %arg12[%c0_44, %c0_45] : memref<128x32xbf16, #tpu.memory_space<vmem>>, vector<128x32xbf16>
    %cst_46 = arith.constant dense<0.000000e+00> : vector<8x32xf32>
    %155 = tpu.matmul %153, %154, %cst_46 {dimension_numbers = #tpu.dot_dimension_numbers<[1], [0], [0], [1], [0, 0, 1, 1], [], []>} : vector<8x128xbf16>, vector<128x32xbf16>, vector<8x32xf32> -> vector<8x32xf32>
    %c0_47 = arith.constant 0 : index
    %c0_48 = arith.constant 0 : index
    %156 = vector.load %arg13[%c0_47, %c0_48] : memref<1x32xf32, #tpu.memory_space<vmem>>, vector<1x32xf32>
    %157 = vector.shape_cast %156 : vector<1x32xf32> to vector<32xf32>
    %158 = vector.shape_cast %157 : vector<32xf32> to vector<1x32xf32>
    %159 = vector.broadcast %158 : vector<1x32xf32> to vector<8x32xf32>
    %160 = arith.addf %155, %159 : vector<8x32xf32>
    %161 = arith.addf %102, %160 : vector<8x32xf32>
    %c0_49 = arith.constant 0 : index
    %c0_50 = arith.constant 0 : index
    %c0_51 = arith.constant 0 : index
    %162 = vector.load %arg14[%c0_49, %c0_50, %c0_51] : memref<1x8x32xf32, #tpu.memory_space<vmem>>, vector<1x8x32xf32>
    %163 = vector.shape_cast %162 : vector<1x8x32xf32> to vector<8x32xf32>
    %164 = vector.shape_cast %161 : vector<8x32xf32> to vector<1x8x32xf32>
    tpu.vector_store %arg14[%c0_49, %c0_50, %c0_51], %164 {strides = array<i32>} : memref<1x8x32xf32, #tpu.memory_space<vmem>>, vector<1x8x32xf32>,
    return
  }
  func.func @transform_0(%arg0: i32, %arg1: i32) -> (i32, i32, i32) {
    %c0_i32 = arith.constant 0 : i32
    %c0_i32_0 = arith.constant 0 : i32
    return %arg0, %arg1, %c0_i32 : i32, i32, i32
  }
  func.func @transform_1(%arg0: i32, %arg1: i32) -> (i32, i32) {
    %c0_i32 = arith.constant 0 : i32
    %c0_i32_0 = arith.constant 0 : i32
    %c0_i32_1 = arith.constant 0 : i32
    return %c0_i32, %c0_i32_0 : i32, i32
  }
  func.func @transform_2(%arg0: i32, %arg1: i32) -> (i32, i32) {
    %c0_i32 = arith.constant 0 : i32
    %c0_i32_0 = arith.constant 0 : i32
    %c0_i32_1 = arith.constant 0 : i32
    return %c0_i32, %c0_i32_0 : i32, i32
  }
  func.func @transform_3(%arg0: i32, %arg1: i32) -> (i32, i32) {
    %c0_i32 = arith.constant 0 : i32
    %c0_i32_0 = arith.constant 0 : i32
    %c0_i32_1 = arith.constant 0 : i32
    return %c0_i32, %c0_i32_0 : i32, i32
  }
  func.func @transform_4(%arg0: i32, %arg1: i32) -> (i32, i32) {
    %c0_i32 = arith.constant 0 : i32
    %c0_i32_0 = arith.constant 0 : i32
    %c0_i32_1 = arith.constant 0 : i32
    return %c0_i32, %c0_i32_0 : i32, i32
  }
  func.func @transform_5(%arg0: i32, %arg1: i32) -> (i32, i32) {
    %c0_i32 = arith.constant 0 : i32
    %c0_i32_0 = arith.constant 0 : i32
    %c0_i32_1 = arith.constant 0 : i32
    return %c0_i32, %c0_i32_0 : i32, i32
  }
  func.func @transform_6(%arg0: i32, %arg1: i32) -> (i32, i32) {
    %c0_i32 = arith.constant 0 : i32
    %c0_i32_0 = arith.constant 0 : i32
    %c0_i32_1 = arith.constant 0 : i32
    return %c0_i32, %c0_i32_0 : i32, i32
  }
  func.func @transform_7(%arg0: i32, %arg1: i32) -> (i32, i32) {
    %c0_i32 = arith.constant 0 : i32
    %c0_i32_0 = arith.constant 0 : i32
    %c0_i32_1 = arith.constant 0 : i32
    return %c0_i32, %c0_i32_0 : i32, i32
  }
  func.func @transform_8(%arg0: i32, %arg1: i32) -> (i32, i32) {
    %c0_i32 = arith.constant 0 : i32
    %c0_i32_0 = arith.constant 0 : i32
    %c0_i32_1 = arith.constant 0 : i32
    return %c0_i32, %c0_i32_0 : i32, i32
  }
  func.func @transform_9(%arg0: i32, %arg1: i32) -> (i32, i32) {
    %c0_i32 = arith.constant 0 : i32
    %c0_i32_0 = arith.constant 0 : i32
    %c0_i32_1 = arith.constant 0 : i32
    return %c0_i32, %c0_i32_0 : i32, i32
  }
  func.func @transform_10(%arg0: i32, %arg1: i32) -> (i32, i32) {
    %c0_i32 = arith.constant 0 : i32
    %c0_i32_0 = arith.constant 0 : i32
    %c0_i32_1 = arith.constant 0 : i32
    return %c0_i32, %c0_i32_0 : i32, i32
  }
  func.func @transform_11(%arg0: i32, %arg1: i32) -> (i32, i32) {
    %c0_i32 = arith.constant 0 : i32
    %c0_i32_0 = arith.constant 0 : i32
    %c0_i32_1 = arith.constant 0 : i32
    return %c0_i32, %c0_i32_0 : i32, i32
  }
  func.func @transform_12(%arg0: i32, %arg1: i32) -> (i32, i32, i32) {
    %c0_i32 = arith.constant 0 : i32
    %c0_i32_0 = arith.constant 0 : i32
    return %arg0, %arg1, %c0_i32 : i32, i32, i32
  }
}

</mosaic_0001>

<bundles_post_ra>
// kernel: tpu_custom_call.1
= control target key start
LH: loop header
LB: loop body
LE: loop exit
PB: predicated region body
PF: predicated region fallthrough
CT: control target
= control target key end

     0   :  { %s2161_s0 = inlined_call_operand.vmem [shape: f32[2,8,32], index: 0, kind: input, shape index: {}]   ;;  %s2162_s1 = inlined_call_operand.vmem [shape: bf16[32,96], index: 1, kind: input, shape index: {}]   ;;  %s2163_s2 = inlined_call_operand.vmem [shape: bf16[32,32], index: 2, kind: input, shape index: {}]   ;;  %s2164_s3 = inlined_call_operand.vmem [shape: f32[1,32], index: 3, kind: input, shape index: {}]   ;;  %s2165_s4 = inlined_call_operand.vmem [shape: f32[1,32], index: 4, kind: input, shape index: {}]   ;;  %s2166_s5 = inlined_call_operand.vmem [shape: f32[1,32], index: 5, kind: input, shape index: {}]   ;;  %s2167_s6 = inlined_call_operand.vmem [shape: f32[1,32], index: 6, kind: input, shape index: {}]   ;;  %s2168_s7 = inlined_call_operand.vmem [shape: f32[1,32], index: 7, kind: input, shape index: {}]   ;;  %s2169_s8 = inlined_call_operand.vmem [shape: bf16[32,128], index: 8, kind: input, shape index: {}]   ;;  %s2170_s9 = inlined_call_operand.vmem [shape: f32[1,128], index: 9, kind: input, shape index: {}]   ;;  %s2171_s10 = inlined_call_operand.vmem [shape: bf16[128,32], index: 10, kind: input, shape index: {}]   ;;  %s2172_s11 = inlined_call_operand.vmem [shape: f32[1,32], index: 11, kind: input, shape index: {}]   ;;  %s2173_s12 = inlined_call_operand.hbm [shape: f32[2,8,32], index: 12, kind: output, shape index: {}]  }
   0x1   :  { %2175 = sst [smem:[#allocation7_spill]] %s2161_s0 }
   0x2   :  { %2176 = sst [smem:[#allocation8_spill]] %s2162_s1 }
   0x3   :  { %2177 = sst [smem:[#allocation9_spill]] %s2163_s2 }
   0x4   :  { %2178 = sst [smem:[#allocation10_spill]] %s2164_s3 }
   0x5   :  { %17 = vsyncpa [#allocation5], 0 }
   0x6   :  { %19 = vsyncpa [#allocation5 + $0x1], 0  ;;  %s1766_s21 = smov 0   ;;  %s1768_s22 = smov 0  }
   0x7   :  { %s1770_s23 = smov 0   ;;  %s1772_s24 = smov 0  }
   0x8   :  { %s1774_s25 = smov 0   ;;  %s1776_s26 = smov 0  }
   0x9 LB: > { %s1206_s27 = sadd.s32 4294967295, %s1638_s26   ;;  %s1207_s28 = sadd.s32 4294967294, %s1638_s26   ;;  %s1638_s26 = sphi %s1776_s26, %s25_s26   ;;  %s1634_s25 = sphi %s1774_s25, %s2206_s25   ;;  %s1630_s24 = sphi %s1772_s24, %s2205_s24   ;;  %s1626_s23 = sphi %s1770_s23, %s2204_s23   ;;  %s1622_s22 = sphi %s1768_s22, %s2203_s22   ;;  %s1618_s21 = sphi %s1766_s21, %s2202_s21  }
   0xa   : > { %s37_s29 = sadd.s32 1, %s1634_s25  ;;  %s305_s30 = sadd.s32 1, %s1626_s23 }
   0xb   : > { %p39_p0 = scmp.ge.s32.totalorder %s37_s29, 2  ;;  %p315_p1 = scmp.ne.s32.totalorder %s1626_s23, %s1622_s22 }
   0xc   : > { %p316_p2 = scmp.eq.s32.totalorder %s1206_s27, 1  ;;  %p321_p3 = scmp.ne.s32.totalorder %s1622_s22, %s1618_s21 }
   0xd   : > { %s2208_s29 = smov (%p39_p0, %s37_s29), 0  ;;  %p322_p5 = scmp.eq.s32.totalorder %s1207_s28, 1 }
   0xe   : > { %p1806_p4 = por %p316_p2, %p315_p1  ;;  %s300_s14 = ssub.s32 %s1634_s25, %s2208_s29 }
   0xf   : > { %p1210_p6 = scmp.ge.s32.totalorder %s1638_s26, 1  ;;  %p303_p7 = scmp.eq.s32.totalorder %s300_s14, 0 }
  0x10   : > { %p1813_p8 = por %p322_p5, %p321_p3  ;;  %p383_p9 = scmp.lt.s32.totalorder %s1638_s26, 3 }
  0x11   : > { %s1819_s16 = scalar_select %p303_p7, %s1626_s23, %s305_s30  }
  0x12   : > { %p384_p10 = pnand %p1210_p6, %p383_p9 }
  0x13   : > { %p427_p11 = scmp.lt.s32.totalorder (!%p384_p10), %s1630_s24, 1  ;;  %s2181_s0 = sld [smem:[#allocation7_spill]] (!%p384_p10) }
  0x14   : > { %387 = sbr.rel (%p384_p10) target bundleno = 1910 (0x776), region = 68  ;;  %s2174_s28 = sand.u32 (!%p384_p10), 1, %s1622_s22  }
  0x15   : > { %s1838_s30 = sshll.u32 (!%p384_p10), %s2174_s28, 3  ;;  %s2182_s1 = sld [smem:[#allocation8_spill]] (!%p384_p10) }
  0x16   : > { %s1694_s19 = smov (!%p384_p10), 120   ;;  %s1695_s20 = smov (!%p384_p10), 112  }
  0x17   : > { %s1697_s14 = smov (!%p384_p10), 64  }
  0x19   : > { %s428_s17 = scalar_select %p427_p11, %s1630_s24, 1  ;;  %vm439_vm0 = vcmask 261120   ;;  %v1692_v2 = vmov 32.0   ;;  %v1469_v23 = vld [vmem:[%s2165_s4] ss:$0 sm:$0xff]  ;;  %vm544_vm5 = vcmask 60416   ;;  %v567_v45 = vlaneseq }
  0x1a   : > { %1471 = vrcp.f32 %v1692_v2  ;;  %v1470_v27 = vld [vmem:[%s2166_s5] ss:$0 sm:$0xff]  ;;  %v1882_v51 = vmov 0.0   ;;  %v1884_v52 = vmov 0.0   ;;  %v1886_v53 = vmov 0.0  }
  0x1b   : > { %s1212_s18 = sshll.u32 %s428_s17, 3  ;;  %v1288_v14 = vld [vmem:[%s2182_s1 + $0x8] sm:$0xff]  ;;  %v1287_v15 = vld [vmem:[%s2182_s1] sm:$0xff]  ;;  %v1876_v47 = vshrl.u32 %v567_v45, 7  ;;  %v1888_v54 = vmov 0.0   ;;  %v1890_v55 = vmov 0.0  }
  0x1c   : > { %s433_s27 = scalar_lea.vmem %s2181_s0, %s1212_s18  ;;  %503 = vmatpush.bf16.msra.mxu0 %v1288_v14  ;;  %s1693_s18 = smov 104   ;;  %v1892_v56 = vmov 0.0   ;;  %v1894_v57 = vmov 0.0   ;;  %v1896_v58 = vmov 0.0   ;;  %v1898_v59 = vmov -inf  }
  0x1d   : > { %v1826_v0 = vld [vmem:[%s433_s27] sm:$0xff]  ;;  %s1696_s27 = smov 96   ;;  %v1900_v60 = vmov -inf   ;;  %v1902_v61 = vmov -inf   ;;  %v1904_v62 = vmov -inf  }
  0x1e   : > { %v440_v1 = vsel %vm439_vm0, %v1826_v0, 0.0 }
  0x1f   : > { %441 = vadd.xlane.f32.xlu0 %v440_v1 }
  0x20   : > { %v1472_v3 = vpop.eup %1471  ;;  %504 = vmatpush.bf16.msra.mxu0 %v1287_v15 }
  0x21   : > { %v444_v4 = vmul.f32 32.0, %v1472_v3  ;;  %vm448_vm1 = vweird.f32 %v1472_v3 }
  0x23   : > { %v445_v5 = vsub.f32 1.0, %v444_v4 }
  0x25   : > { %v446_v6 = vmul.f32 %v1472_v3, %v445_v5 }
  0x27   : > { %v447_v7 = vadd.f32 %v1472_v3, %v446_v6 }
  0x29   : > { %v1830_v8 = vsel %vm448_vm1, %v1472_v3, %v447_v7 }
  0x92   : > { %v442_v9 = vpop.xlane.xlu0 %441 }
  0x93   : > { %v450_v10 = vmul.f32 %v1830_v8, %v442_v9 }
  0x95   : > { %v451_v11 = vsub.f32 %v1826_v0, %v450_v10 }
  0x97   : > { %v452_v12 = vmul.f32 %v451_v11, %v451_v11  ;;  %v460_v26 = vmul.f32 %v1469_v23, %v451_v11 }
  0x99   : > { %v453_v13 = vsel %vm439_vm0, %v452_v12, 0.0 }
  0x9a   : > { %454 = vadd.xlane.f32.xlu0 %v453_v13 }
 0x10d   : > { %v455_v16 = vpop.xlane.xlu0 %454 }
 0x10e   : > { %v456_v17 = vmul.f32 %v455_v16, %v1830_v8 }
 0x110   : > { %v461_v18 = vadd.f32 1e-05, %v456_v17 }
 0x112   : > { %1473 = vrsqrt.f32 %v461_v18  ;;  %vm468_vm3 = vweird.f32 %v461_v18 }
 0x118   : > { %v1474_v19 = vpop.eup %1473 }
 0x119   : > { %v463_v20 = vmul.f32 %v1474_v19, %v461_v18  ;;  %vm469_vm2 = vweird.f32 %v1474_v19 }
 0x11a   : > { %vm470_vm4 = vmor %vm468_vm3, %vm469_vm2 }
 0x11b   : > { %v464_v21 = vmul.f32 %v1474_v19, %v463_v20 }
 0x11d   : > { %v465_v22 = vmul.f32 0.5, %v464_v21 }
 0x11f   : > { %v466_v24 = vsub.f32 1.5, %v465_v22 }
 0x121   : > { %v467_v25 = vmul.f32 %v1474_v19, %v466_v24 }
 0x123   : > { %v471_v28 = vsel %vm470_vm4, %v1474_v19, %v467_v25 }
 0x124   : > { %v472_v29 = vmul.f32 %v471_v28, %v460_v26 }
 0x126   : > { %v476_v30 = vadd.f32 %v1470_v27, %v472_v29 }
 0x128   : > { %v477_v31 = vpack.c.bf16 %v476_v30, %v476_v30 }
 0x12a   : > { %1221 = vmatmul.msk.bf16.vlgmr.msra.gmra.mxu0 %vm439_vm0, %v477_v31 }
 0x1a7   : > { %v506_v32 = vpop.f32.mrf.mxu0 }
 0x1a8   : > { %517 = vrot.lane.b32.xlu2 %v506_v32, %s1693_s18  ;;  %511 = vrot.lane.b32.xlu1 %v506_v32, %s1694_s19  ;;  %v1854_v33 = vpack.c.bf16 %v506_v32, %v506_v32  ;;  %s1906_s18 = smov 0  }
 0x1af   : > { %v508_v34 = vpop.f32.mrf.mxu0 }
 0x1b0   : > { %514 = vrot.lane.b32.xlu1 %v506_v32, %s1695_s20  ;;  %528 = vrot.lane.b32.xlu2 %v1854_v33, %s1696_s27 }
 0x1b8   : > { %549 = vrot.lane.b32.xlu1 %v1854_v33, %s1697_s14 }
 0x202   : > { %v518_v35 = vpop.permute.xlu2 %517 }
 0x203   : > { %v1858_v36 = vpack.c.bf16 %v518_v35, %v518_v35 }
 0x205   : > { %534 = vrot.lane.b32.xlu2 %v1858_v36, %s1696_s27 }
 0x20a   : > { %v529_v37 = vpop.permute.xlu2 %528 }
 0x20b   : > { %545 = vst.msk [vmem:[#allocation2] sm:$0xf] %vm544_vm5, %v529_v37 }
 0x21a   : > { %v512_v38 = vpop.permute.xlu1 %511 }
 0x21b   : > { %v1862_v39 = vpack.c.bf16 %v512_v38, %v512_v38 }
 0x21d   : > { %530 = vrot.lane.b32.xlu0 %v1862_v39, %s1696_s27  ;;  %551 = vrot.lane.b32.xlu2 %v1862_v39, %s1697_s14 }
 0x222   : > { %v515_v40 = vpop.permute.xlu1 %514 }
 0x223   : > { %v1866_v41 = vpack.c.bf16 %v515_v40, %v515_v40 }
 0x225   : > { %532 = vrot.lane.b32.xlu1 %v1866_v41, %s1696_s27  ;;  %555 = vrot.lane.b32.xlu2 %v1858_v36, %s1697_s14 }
 0x22a   : > { %v550_v42 = vpop.permute.xlu1 %549 }
 0x22b   : > { %563 = vst.msk [vmem:[#allocation3] sm:$0xf] %vm544_vm5, %v550_v42 }
 0x22d   : > { %553 = vrot.lane.b32.xlu1 %v1866_v41, %s1697_s14 }
 0x25f   : > { %v535_v43 = vpop.permute.xlu2 %534 }
 0x260   : > { %548 = vst.msk [vmem:[#allocation2 + $0xc] sm:$0xf] %vm544_vm5, %v535_v43 }
 0x277   : > { %v552_v44 = vpop.permute.xlu2 %551 }
 0x278   : > { %564 = vst.msk [vmem:[#allocation3 + $0x4] sm:$0xf] %vm544_vm5, %v552_v44 }
 0x27f   : > { %v556_v46 = vpop.permute.xlu2 %555 }
 0x280   : > { %566 = vst.msk [vmem:[#allocation3 + $0xc] sm:$0xf] %vm544_vm5, %v556_v46 }
 0x28f   : > { %v531_v48 = vpop.permute.xlu0 %530 }
 0x290   : > { %546 = vst.msk [vmem:[#allocation2 + $0x4] sm:$0xf] %vm544_vm5, %v531_v48 }
 0x297   : > { %v533_v49 = vpop.permute.xlu1 %532 }
 0x298   : > { %547 = vst.msk [vmem:[#allocation2 + $0x8] sm:$0xf] %vm544_vm5, %v533_v49 }
 0x29f   : > { %v554_v50 = vpop.permute.xlu1 %553 }
 0x2a0   : > { %565 = vst.msk [vmem:[#allocation3 + $0x8] sm:$0xf] %vm544_vm5, %v554_v50 }
 0x2a1 LB: >> { %s1222_s19 = sshll.u32 %s1690_s18, 3  ;;  %vm605_vm6 = vcmask 64512   ;;  %v683_v9 = vand.u32 127, %v567_v45  ;;  %vm764_vm8 = vcmask 1043456   ;;  %s575_s18 = sadd.s32 1, %s1690_s18   ;;  %s1690_s18 = sphi %s1906_s18, %s575_s18   ;;  %v1686_v62 = vphi %v1904_v62, %v2196_v62   ;;  %v1682_v61 = vphi %v1902_v61, %v2195_v61   ;;  %v1678_v60 = vphi %v1900_v60, %v2194_v60   ;;  %v1674_v59 = vphi %v1898_v59, %v2193_v59   ;;  %v1670_v58 = vphi %v1896_v58, %v2192_v58   ;;  %v1666_v57 = vphi %v1894_v57, %v2191_v57   ;;  %v1662_v56 = vphi %v1892_v56, %v2190_v56   ;;  %v1658_v55 = vphi %v1890_v55, %v2189_v55   ;;  %v1654_v54 = vphi %v1888_v54, %v2188_v54   ;;  %v1650_v53 = vphi %v1886_v53, %v2187_v53   ;;  %v1646_v52 = vphi %v1884_v52, %v2186_v52   ;;  %v1642_v51 = vphi %v1882_v51, %v2185_v51  }
 0x2a2   : >> { %s1948_s20 = sshra.s32 %s1222_s19, 3  ;;  %v684_v10 = vstv %s1222_s19  ;;  %p2016_p12 = scmp.ge.s32.totalorder %s575_s18, 1 }
 0x2a3   : >> { %s1223_s27 = sshll.u32 %s1948_s20, 2  ;;  %v685_v11 = vadd.s32 %v684_v10, %v683_v9  ;;  %s2197_s2 = sld [smem:[#allocation9_spill]] (%p2016_p12)  ;;  %vm864_vm9 = vcmask (%p2016_p12), 130048   ;;  %vm866_vm10 = vcmask (%p2016_p12), 195584  }
 0x2a4   : >> { %s594_s14 = scalar_lea.vmem [#allocation2], %s1223_s27  ;;  %s600_s19 = scalar_lea.vmem [#allocation3], %s1223_s27 }
 0x2a5   : >> { %v595_v63 = vld [vmem:[%s594_s14] sm:$0xf]  ;;  %v597_v1 = vld [vmem:[%s594_s14 + $0x8] sm:$0xf]  ;;  %v598_v2 = vld [vmem:[%s594_s14 + $0xc] sm:$0xf]  ;;  %vm686_vm7 = vcmp.le.s32.totalorder %v685_v11, %v1876_v47 }
 0x2a6   : >> { %v610_v3 = vsel %vm605_vm6, %v595_v63, 0  ;;  %v648_v4 = vsel %vm605_vm6, %v597_v1, 0  ;;  %v667_v5 = vsel %vm605_vm6, %v598_v2, 0  ;;  %v596_v6 = vld [vmem:[%s594_s14 + $0x4] sm:$0xf]  ;;  %s1698_s27 = smov (%p2016_p12), 8  }
 0x2a7   : >> { %619 = vmatpush.bf16.xpose.msra.mxu0 %v610_v3  ;;  %657 = vmatpush.bf16.xpose.msra.mxu2 %v648_v4  ;;  %v629_v7 = vsel %vm605_vm6, %v596_v6, 0  ;;  %v601_v28 = vld [vmem:[%s600_s19] sm:$0xf]  ;;  %v603_v30 = vld [vmem:[%s600_s19 + $0x8] sm:$0xf]  ;;  %s1699_s14 = smov (%p2016_p12), 24  }
 0x2a8   : >> { %676 = vmatpush.bf16.xpose.msra.mxu3 %v667_v5  ;;  %638 = vmatpush.bf16.xpose.msra.mxu1 %v629_v7  ;;  %v766_v29 = vsel %vm764_vm8, %v601_v28, 0  ;;  %v604_v31 = vld [vmem:[%s600_s19 + $0xc] sm:$0xf]  ;;  %v804_v32 = vsel %vm764_vm8, %v603_v30, 0  ;;  %v602_v35 = vld [vmem:[%s600_s19 + $0x4] sm:$0xf] }
 0x2a9   : >> { %v823_v34 = vsel %vm764_vm8, %v604_v31, 0  ;;  %v785_v37 = vsel %vm764_vm8, %v602_v35, 0  ;;  %s1700_s19 = smov (%p2016_p12), 16   ;;  %s2198_s3 = sld [smem:[#allocation10_spill]] (%p2016_p12) }
 0x2aa   : > { %s1284_s1 = sshll.u32 (%p2016_p12), %s1630_s24, 3  ;;  %s2199_s18 = scalar_lea.vmem (%p2016_p12), [#allocation4], %s1838_s30 }
 0x2ab   : > { %s1083_s20 = sshll.u32 (%p2016_p12), %s2199_s18, 4  ;;  %s2200_s24 = smov (%p2016_p12), %s2199_s18  ;;  %s1084_s20 = int_to_ptr.vmem [resolvable:$true] %s1083_s20 }
 0x2ac   : > { %s2201_s17 = sand.u32 (%p2016_p12), 1, %s1622_s22   ;;  %s1528_s0 = scalar_lea.hbm (%p2016_p12), %s2173_s12, 16 }
 0x2ae   : >> { %1225 = vmatmul.msk.bf16.vlgmr.msra.gmra.mxu0 %vm605_vm6, %v1854_v33  ;;  %1227 = vmatmul.msk.bf16.vlgmr.msra.gmra.mxu2 %vm605_vm6, %v1866_v41  ;;  %v1289_v33 = vld [vmem:[%s2197_s2] sm:$0xff] (%p2016_p12) }
 0x2af   : >> { %1228 = vmatmul.msk.bf16.vlgmr.msra.gmra.mxu3 %vm605_vm6, %v1858_v36  ;;  %1226 = vmatmul.msk.bf16.vlgmr.msra.gmra.mxu1 %vm605_vm6, %v1862_v39 }
 0x2b0   : >> { %775 = vmatpush.bf16.msrb.mxu0 %v766_v29  ;;  %813 = vmatpush.bf16.msrb.mxu2 %v804_v32 }
 0x2b1   : >> { %832 = vmatpush.bf16.msrb.mxu3 %v823_v34  ;;  %794 = vmatpush.bf16.msrb.mxu1 %v785_v37 }
 0x32b   : >> { %v621_v12 = vpop.f32.mrf.mxu0 }
 0x32c   : >> { %v689_v13 = vsel %vm686_vm7, %v621_v12, -inf  ;;  %v640_v14 = vpop.f32.mrf.mxu1 }
 0x32d   : >> { %v693_v15 = vsel %vm605_vm6, %v689_v13, -inf  ;;  %v690_v16 = vsel %vm686_vm7, %v640_v14, -inf }
 0x32e   : >> { %694 = vmax.xlane.f32.xlu1 %v693_v15  ;;  %v696_v21 = vsel %vm605_vm6, %v690_v16, -inf }
 0x331   : >> { %v659_v17 = vpop.f32.mrf.mxu2 }
 0x332   : >> { %v691_v18 = vsel %vm686_vm7, %v659_v17, -inf  ;;  %v678_v19 = vpop.f32.mrf.mxu3 }
 0x333   : >> { %v699_v20 = vsel %vm605_vm6, %v691_v18, -inf  ;;  %v623_v22 = vpop.f32.mrf.mxu0  ;;  %v692_v24 = vsel %vm686_vm7, %v678_v19, -inf }
 0x334   : >> { %700 = vmax.xlane.f32.xlu0 %v699_v20  ;;  %v642_v23 = vpop.f32.mrf.mxu1  ;;  %v702_v26 = vsel %vm605_vm6, %v692_v24, -inf }
 0x336   : >> { %697 = vmax.xlane.f32.xlu1 %v696_v21 }
 0x339   : >> { %v661_v25 = vpop.f32.mrf.mxu2 }
 0x33a   : >> { %v680_v27 = vpop.f32.mrf.mxu3 }
 0x33c   : >> { %703 = vmax.xlane.f32.xlu0 %v702_v26 }
 0x3a1   : >> { %v695_v38 = vpop.xlane.xlu1 %694 }
 0x3a2   : >> { %v1974_v40 = vmax.f32 %v1686_v62, %v695_v38  }
 0x3a4   : >> { %v709_v42 = vsub.f32 %v1686_v62, %v1974_v40  ;;  %v721_v43 = vsub.f32 %v689_v13, %v1974_v40 }
 0x3a6   : >> { %v725_v44 = vmul.f32 1.442695, %v721_v43  ;;  %v713_v20 = vmul.f32 1.442695, %v709_v42 }
 0x3a7   : >> { %v701_v46 = vpop.xlane.xlu0 %700 }
 0x3a8   : >> { %v1980_v48 = vmax.f32 %v1678_v60, %v701_v46   ;;  %1475 = vpow2.f32 %v725_v44 }
 0x3a9   : >> { %v698_v49 = vpop.xlane.xlu1 %697 }
 0x3aa   : >> { %v711_v50 = vsub.f32 %v1678_v60, %v1980_v48  ;;  %v723_v63 = vsub.f32 %v691_v18, %v1980_v48  ;;  %v1986_v1 = vmax.f32 %v1682_v61, %v698_v49  }
 0x3ac   : >> { %v729_v2 = vmul.f32 1.442695, %v723_v63  ;;  %v710_v62 = vsub.f32 %v1682_v61, %v1986_v1  ;;  %v722_v3 = vsub.f32 %v690_v16, %v1986_v1  ;;  %v717_v21 = vmul.f32 1.442695, %v711_v50 }
 0x3ae   : >> { %v727_v4 = vmul.f32 1.442695, %v722_v3  ;;  %v1476_v5 = vpop.eup %1475  ;;  %1477 = vpow2.f32 %v729_v2  ;;  %v715_v22 = vmul.f32 1.442695, %v710_v62 }
 0x3af   : >> { %v704_v6 = vpop.xlane.xlu0 %703  ;;  %v737_v60 = vsel %vm605_vm6, %v1476_v5, 0.0  ;;  %v757_v9 = vpack.c.bf16 %v1476_v5, %v1476_v5 }
 0x3b0   : >> { %v1992_v7 = vmax.f32 %v1674_v59, %v704_v6   ;;  %1479 = vpow2.f32 %v727_v4  ;;  %738 = vadd.xlane.f32.xlu2 %v737_v60 }
 0x3b1   : >> { %1229 = vmatmul.msk.bf16.vlgmr.msrb.gmra.mxu0 %vm605_vm6, %v757_v9 }
 0x3b2   : >> { %v712_v10 = vsub.f32 %v1674_v59, %v1992_v7  ;;  %v724_v11 = vsub.f32 %v692_v24, %v1992_v7 }
 0x3b4   : >> { %v731_v61 = vmul.f32 1.442695, %v724_v11  ;;  %v1478_v12 = vpop.eup %1477  ;;  %v719_v25 = vmul.f32 1.442695, %v712_v10 }
 0x3b5   : >> { %v743_v13 = vsel %vm605_vm6, %v1478_v12, 0.0  ;;  %v759_v14 = vpack.c.bf16 %v1478_v12, %v1478_v12 }
 0x3b6   : >> { %v1480_v15 = vpop.eup %1479  ;;  %1481 = vpow2.f32 %v731_v61  ;;  %744 = vadd.xlane.f32.xlu0 %v743_v13  ;;  %v2195_v61 = vmov %v1986_v1 }
 0x3b7   : >> { %1231 = vmatmul.msk.bf16.vlgmr.msrb.gmra.mxu2 %vm605_vm6, %v759_v14  ;;  %v740_v16 = vsel %vm605_vm6, %v1480_v15, 0.0  ;;  %v758_v17 = vpack.c.bf16 %v1480_v15, %v1480_v15  ;;  %1483 = vpow2.f32 %v713_v20  ;;  %v1491_v61 = vld [vmem:[%s2198_s3] ss:$0 sm:$0xff] (%p2016_p12) }
 0x3b8   : >> { %741 = vadd.xlane.f32.xlu2 %v740_v16  ;;  %1485 = vpow2.f32 %v717_v21 }
 0x3b9   : >> { %1230 = vmatmul.msk.bf16.vlgmr.msrb.gmra.mxu1 %vm605_vm6, %v758_v17  ;;  %1487 = vpow2.f32 %v715_v22  ;;  %v1291_v22 = vld [vmem:[%s2169_s8] sm:$0xff] (%p2016_p12) }
 0x3ba   : >> { %1489 = vpow2.f32 %v719_v25 }
 0x3bc   : >> { %v1482_v59 = vpop.eup %1481 }
 0x3bd   : >> { %v746_v18 = vsel %vm605_vm6, %v1482_v59, 0.0  ;;  %v760_v19 = vpack.c.bf16 %v1482_v59, %v1482_v59  ;;  %v1484_v23 = vpop.eup %1483  ;;  %v2193_v59 = vmov %v1992_v7 }
 0x3be   : >> { %747 = vadd.xlane.f32.xlu1 %v746_v18  ;;  %v733_v24 = vmul.f32 %v1670_v58, %v1484_v23  ;;  %v1486_v28 = vpop.eup %1485  ;;  %v753_v42 = vmul.f32 %v1654_v54, %v1484_v23  ;;  %v1300_v23 = vld [vmem:[%s2171_s10 + $0x38] sm:$0xff] (%p2016_p12) }
 0x3bf   : >> { %1232 = vmatmul.msk.bf16.vlgmr.msrb.gmra.mxu3 %vm605_vm6, %v760_v19  ;;  %v1488_v29 = vpop.eup %1487  ;;  %v735_v30 = vmul.f32 %v1662_v56, %v1486_v28  ;;  %v755_v56 = vmul.f32 %v1646_v52, %v1486_v28  ;;  %1054 = vmatpush.bf16.msra.mxu2 (%p2016_p12), %v1300_v23 }
 0x3c0   : >> { %v734_v34 = vmul.f32 %v1666_v57, %v1488_v29  ;;  %v1490_v38 = vpop.eup %1489 }
 0x3c1   : >> { %v736_v46 = vmul.f32 %v1658_v55, %v1490_v38  ;;  %v756_v5 = vmul.f32 %v1642_v51, %v1490_v38 }
 0x423   : >> { %v739_v26 = vpop.xlane.xlu2 %738 }
 0x424   : >> { %v2006_v58 = vadd.f32 %v739_v26, %v733_v24   ;;  %v1299_v24 = vld [vmem:[%s2171_s10 + $0x30] sm:$0xff] (%p2016_p12) }
 0x425   : > { %1055 = vmatpush.bf16.msra.mxu2 (%p2016_p12), %v1299_v24 }
 0x426   : >> { %v2183_v27 = vmov %v2006_v58  ;;  %v754_v58 = vmul.f32 %v1650_v53, %v1488_v29 }
 0x429   : >> { %v745_v31 = vpop.xlane.xlu0 %744 }
 0x42a   : >> { %v751_v32 = vadd.f32 %v745_v31, %v735_v30  }
 0x42b   : >> { %v742_v35 = vpop.xlane.xlu2 %741 }
 0x42c   : >> { %v750_v37 = vadd.f32 %v742_v35, %v734_v34  }
 0x42e   : >> { %v777_v43 = vpop.f32.mrf.mxu0  ;;  %1496 = vrcp.f32 (%p2016_p12), %v750_v37 }
 0x42f   : >> { %v838_v44 = vadd.f32 %v777_v43, %v753_v42  }
 0x431   : >> { %v748_v49 = vpop.xlane.xlu1 %747 }
 0x432   : >> { %v752_v50 = vadd.f32 %v748_v49, %v736_v46   ;;  %v1298_v46 = vld [vmem:[%s2171_s10 + $0x28] sm:$0xff] (%p2016_p12)  ;;  %v1297_v49 = vld [vmem:[%s2171_s10 + $0x20] sm:$0xff] (%p2016_p12) }
 0x433   : > { %1056 = vmatpush.bf16.msra.mxu2 (%p2016_p12), %v1298_v46 }
 0x434   : >> { %v2189_v55 = vmov %v752_v50  ;;  %1498 = vrcp.f32 (%p2016_p12), %v752_v50  ;;  %v1497_v10 = vpop.eup (%p2016_p12), %1496  ;;  %v1296_v50 = vld [vmem:[%s2171_s10 + $0x18] sm:$0xff] (%p2016_p12) }
 0x435   : > { %1500 = vrcp.f32 (%p2016_p12), %v751_v32 }
 0x436   : >> { %v779_v63 = vpop.f32.mrf.mxu0  ;;  %v796_v2 = vpop.f32.mrf.mxu1  ;;  %1502 = vrcp.f32 (%p2016_p12), %v2183_v27 }
 0x437   : >> { %v839_v3 = vadd.f32 %v796_v2, %v754_v58   ;;  %v2192_v58 = vmov %v2183_v27  ;;  %1057 = vmatpush.bf16.msra.mxu2 (%p2016_p12), %v1297_v49  ;;  %v1294_v63 = vld [vmem:[%s2171_s10 + $0x8] sm:$0xff] (%p2016_p12)  ;;  %v1293_v2 = vld [vmem:[%s2171_s10] sm:$0xff] (%p2016_p12) }
 0x438   : > { %v1295_v58 = vld [vmem:[%s2171_s10 + $0x10] sm:$0xff] (%p2016_p12) }
 0x439   : >> { %v2187_v53 = vmov %v839_v3  ;;  %v847_v11 = vmul.f32 (%p2016_p12), %v1497_v10, %v839_v3  ;;  %v1494_v3 = vld [vmem:[%s2170_s9] ss:$0 sm:$0xff] (%p2016_p12) }
 0x43a   : >> { %v815_v62 = vpop.f32.mrf.mxu2  ;;  %v1499_v12 = vpop.eup (%p2016_p12), %1498 }
 0x43b   : >> { %v840_v4 = vadd.f32 %v815_v62, %v755_v56   ;;  %v2190_v56 = vmov %v751_v32  ;;  %v2196_v62 = vmov %v1974_v40  ;;  %851 = vrot.lane.b32.xlu0 (%p2016_p12), %v847_v11, %s1698_s27  ;;  %v1290_v40 = vld [vmem:[%s2197_s2 + $0x8] sm:$0xff] (%p2016_p12)  ;;  %v1492_v32 = vld [vmem:[%s2167_s6] ss:$0 sm:$0xff] (%p2016_p12)  ;;  %1058 = vmatpush.bf16.msra.mxu2 (%p2016_p12), %v1296_v50  ;;  %s1070_s2 = scalar_lea.sflag (%p2016_p12), [#allocation5], %s2201_s17 }
 0x43c   : > { %894 = vmatpush.bf16.msra.mxu0 (%p2016_p12), %v1290_v40 }
 0x43d   : >> { %v2186_v52 = vmov %v840_v4 }
 0x43e   : >> { %v798_v57 = vpop.f32.mrf.mxu1 }
 0x43f   : >> { %v2191_v57 = vmov %v750_v37  ;;  %1059 = vmatpush.bf16.msra.mxu2 (%p2016_p12), %v1295_v58 }
 0x440   : > { %895 = vmatpush.bf16.msra.mxu0 (%p2016_p12), %v1289_v33 }
 0x442   : >> { %v817_v6 = vpop.f32.mrf.mxu2  ;;  %v834_v54 = vpop.f32.mrf.mxu3 }
 0x443   : >> { %v841_v9 = vadd.f32 %v834_v54, %v756_v5   ;;  %v2188_v54 = vmov %v838_v44  ;;  %1060 = vmatpush.bf16.msra.mxu2 (%p2016_p12), %v1294_v63 }
 0x445   : >> { %v2185_v51 = vmov %v841_v9  ;;  %v849_v7 = vmul.f32 (%p2016_p12), %v1499_v12, %v841_v9 }
 0x447   : > { %577 = sbr.rel (!%p2016_p12) target bundleno = 673 (0x2a1), region = 114  ;;  %859 = vrot.lane.b32.xlu1 (%p2016_p12), %v849_v7, %s1699_s14  ;;  %1061 = vmatpush.bf16.msra.mxu2 (%p2016_p12), %v1293_v2 }
 0x44a   : >> { %v836_v60 = vpop.f32.mrf.mxu3 }
 0x44b   : >> { %v2194_v60 = vmov %v1980_v48  ;;  %v1501_v48 = vpop.eup (%p2016_p12), %1500 }
 0x44c   : > { %v848_v1 = vmul.f32 %v1501_v48, %v840_v4  ;;  %v1503_v39 = vpop.eup %1502  ;;  %v1495_v48 = vld [vmem:[%s2172_s11] ss:$0 sm:$0xff] }
 0x44d   : > { %v846_v41 = vmul.f32 %v1503_v39, %v838_v44 }
 0x44e   : > { %855 = vrot.lane.b32.xlu0 %v848_v1, %s1700_s19  ;;  %s1081_s19 = scalar_lea.hbm %s2173_s12, %s1284_s1 }
 0x44f   : > { %s1085_s28 = sshll.u32 %s1081_s19, 4  ;;  %s1086_s28 = int_to_ptr.hbm [resolvable:$true] %s1085_s28 }
 0x450   : > { %s1522_s27 = sshra.s32 %s1086_s28, 4  ;;  %s1523_s27 = int_to_ptr.hbm [resolvable:$true] %s1522_s27 }
 0x451   : > { %s1524_s3 = scalar_lea.hbm %s1523_s27, 8  ;;  %p1529_p2 = scmp.lt.s32.totalorder %s1523_s27, %s2173_s12 }
 0x452   : > { %p1525_p13 = scmp.ne.s32.totalorder %s1523_s27, %s1524_s3  ;;  %p1530_p3 = scmp.lt.s32.totalorder %s1528_s0, %s1524_s3 }
 0x454   : > { %p1526_p0 = pnand %p1525_p13, %p1806_p4  ;;  %p1531_p5 = por %p1530_p3, %p1529_p2 }
 0x456   : > { %p1527_p1 = pneg %p1526_p0 }
 0x458   : > { %p1532_p6 = pnand %p1531_p5, %p1527_p1 }
 0x4ad   : > { %v852_v36 = vpop.permute.xlu0 %851 }
 0x4ae   : > { %v863_v47 = vsel %vm605_vm6, %v846_v41, %v852_v36 }
 0x4b9   : > { %v860_v45 = vpop.permute.xlu1 %859 }
 0x4c0   : > { %v856_v51 = vpop.permute.xlu0 %855 }
 0x4c1   : > { %v865_v52 = vsel %vm864_vm9, %v863_v47, %v856_v51 }
 0x4c2   : > { %v867_v53 = vsel %vm866_vm10, %v865_v52, %v860_v45 }
 0x4c3   : > { %v868_v55 = vpack.c.bf16 %v867_v53, %v867_v53 }
 0x4c5   : > { %1241 = vmatmul.msk.bf16.vlgmr.msra.gmra.mxu0 %vm439_vm0, %v868_v55 }
 0x542   : > { %v897_v13 = vpop.f32.mrf.mxu0 }
 0x543   : > { %v901_v14 = vadd.f32 %v897_v13, %v1826_v0  ;;  %v1292_v0 = vld [vmem:[%s2169_s8 + $0x8] sm:$0xff] }
 0x544   : > { %969 = vmatpush.bf16.msra.mxu1 %v1292_v0 }
 0x545   : > { %v2066_v15 = vadd.f32 %v1491_v61, %v901_v14 }
 0x547   : > { %v909_v16 = vsel %vm439_vm0, %v2066_v15, 0.0 }
 0x548   : > { %910 = vadd.xlane.f32.xlu1 %v909_v16  ;;  %970 = vmatpush.bf16.msra.mxu1 %v1291_v22 }
 0x54a   : > { %v899_v17 = vpop.f32.mrf.mxu0 }
 0x5bb   : > { %v911_v59 = vpop.xlane.xlu1 %910 }
 0x5bc   : > { %v912_v18 = vmul.f32 %v911_v59, %v1830_v8 }
 0x5be   : > { %v913_v19 = vsub.f32 %v2066_v15, %v912_v18 }
 0x5c0   : > { %v914_v20 = vmul.f32 %v913_v19, %v913_v19  ;;  %v922_v37 = vmul.f32 %v1492_v32, %v913_v19 }
 0x5c2   : > { %v915_v21 = vsel %vm439_vm0, %v914_v20, 0.0 }
 0x5c3   : > { %916 = vadd.xlane.f32.xlu2 %v915_v21 }
 0x636   : > { %v917_v25 = vpop.xlane.xlu2 %916 }
 0x637   : > { %v918_v26 = vmul.f32 %v917_v25, %v1830_v8  ;;  %v1493_v8 = vld [vmem:[%s2168_s7] ss:$0 sm:$0xff] }
 0x639   : > { %v923_v27 = vadd.f32 1e-05, %v918_v26 }
 0x63b   : > { %1504 = vrsqrt.f32 %v923_v27  ;;  %vm930_vm12 = vweird.f32 %v923_v27 }
 0x641   : > { %v1505_v28 = vpop.eup %1504 }
 0x642   : > { %v925_v29 = vmul.f32 %v1505_v28, %v923_v27  ;;  %vm931_vm11 = vweird.f32 %v1505_v28 }
 0x643   : > { %vm932_vm13 = vmor %vm930_vm12, %vm931_vm11 }
 0x644   : > { %v926_v30 = vmul.f32 %v1505_v28, %v925_v29 }
 0x646   : > { %v927_v31 = vmul.f32 0.5, %v926_v30 }
 0x648   : > { %v928_v34 = vsub.f32 1.5, %v927_v31 }
 0x64a   : > { %v929_v35 = vmul.f32 %v1505_v28, %v928_v34 }
 0x64c   : > { %v933_v38 = vsel %vm932_vm13, %v1505_v28, %v929_v35 }
 0x64d   : > { %v934_v42 = vmul.f32 %v933_v38, %v922_v37 }
 0x64f   : > { %v938_v43 = vadd.f32 %v1493_v8, %v934_v42 }
 0x651   : > { %v939_v44 = vpack.c.bf16 %v938_v43, %v938_v43 }
 0x653   : > { %1250 = vmatmul.msk.bf16.vlgmr.msra.gmra.mxu1 %vm439_vm0, %v939_v44 }
 0x6d0   : > { %v972_v56 = vpop.f32.mrf.mxu1 }
 0x6d1   : > { %v973_v62 = vadd.f32 %v1494_v3, %v972_v56 }
 0x6d3   : > { %v977_v4 = vmul.f32 %v973_v62, %v973_v62  ;;  %v976_v10 = vmul.f32 0.5, %v973_v62 }
 0x6d5   : > { %v978_v57 = vmul.f32 %v977_v4, %v973_v62 }
 0x6d7   : > { %v979_v5 = vmul.f32 0.044715, %v978_v57 }
 0x6d8   : > { %v974_v6 = vpop.f32.mrf.mxu1 }
 0x6d9   : > { %v980_v54 = vadd.f32 %v979_v5, %v973_v62 }
 0x6db   : > { %v981_v9 = vmul.f32 0.7978845, %v980_v54 }
 0x6dd   : > { %1506 = vtanh.f32 %v981_v9 }
 0x6e3   : > { %v1507_v60 = vpop.eup %1506 }
 0x6e4   : > { %v983_v11 = vadd.f32 1.0, %v1507_v60 }
 0x6e6   : > { %v984_v12 = vmul.f32 %v983_v11, %v976_v10 }
 0x6e8   : > { %v985_v7 = vpack.c.bf16 %v984_v12, %v984_v12 }
 0x6ea   : > { %1062 = vmatmul.bf16.vlgmr.msra.gmra.mxu2 %v985_v7 }
 0x76d   : > { %v1063_v1 = vpop.f32.mrf.mxu2 }
 0x76e   : > { %v1064_v40 = vadd.f32 %v1495_v48, %v1063_v1 }
 0x770   : > { %v1067_v33 = vadd.f32 %v1064_v40, %v2066_v15 }
 0x772   : > { %1068 = vst.msk [vmem:[%s2200_s24] sm:$0xff] %vm439_vm0, %v1067_v33 }
 0x773   : > { %1535 = shalt.err (!%p1532_p6)
}
 0x774   : > { %1301 = dma.vmem_to_hbm [thread:$0]  (%p1806_p4), %s1084_s20, 128, %s1086_s28, %s1070_s2  }
 0x775   : > { %v1065_v36 = vpop.f32.mrf.mxu2 }
 0x776 PF: > { %p1307_p7 = scmp.ge.s32.totalorder %s1638_s26, 2  ;;  %s1097_s30 = sand.u32 1, %s1618_s21  }
 0x777   : > { %s1098_s24 = scalar_lea.sflag [#allocation5], %s1097_s30 }
 0x778   : > { %p1304_p9 = pnand %p1307_p7, %p1813_p8 }
 0x77a   : > { %p1305_p10 = pneg %p1304_p9 }
 0x77c   : > { %1613 = dma.done.wait (%p1305_p10), %s1098_s24, 128  }
 0x77d   : > { %1615 = vsyncadd (%p1305_p10), %s1098_s24, 4294967168  ;;  %s25_s26 = sadd.s32 1, %s1638_s26   ;;  %s2202_s21 = smov %s1622_s22 }
 0x77e   : > { %p22_p11 = scmp.ge.s32.totalorder %s25_s26, 4   ;;  %s2203_s22 = smov %s1626_s23 }
 0x77f   : > { %s2204_s23 = smov %s1819_s16  ;;  %s2205_s24 = smov %s1634_s25 }
 0x780   : > { %s2206_s25 = smov %s2208_s29  ;;  %24 = sbr.rel (!%p22_p11) target bundleno = 9 (0x9), region = 125 }
 0x785   :  { %1104 = vsyncpa [#allocation5], 1 }
 0x786   :  { %1106 = vsyncpa [#allocation5 + $0x1], 1 }

// kernel: tpu_custom_call.1
= control target key start
LH: loop header
LB: loop body
LE: loop exit
PB: predicated region body
PF: predicated region fallthrough
CT: control target
= control target key end

     0   :  { %s2161_s0 = inlined_call_operand.vmem [shape: f32[2,8,32], index: 0, kind: input, shape index: {}]   ;;  %s2162_s1 = inlined_call_operand.vmem [shape: bf16[32,96], index: 1, kind: input, shape index: {}]   ;;  %s2163_s2 = inlined_call_operand.vmem [shape: bf16[32,32], index: 2, kind: input, shape index: {}]   ;;  %s2164_s3 = inlined_call_operand.vmem [shape: f32[1,32], index: 3, kind: input, shape index: {}]   ;;  %s2165_s4 = inlined_call_operand.vmem [shape: f32[1,32], index: 4, kind: input, shape index: {}]   ;;  %s2166_s5 = inlined_call_operand.vmem [shape: f32[1,32], index: 5, kind: input, shape index: {}]   ;;  %s2167_s6 = inlined_call_operand.vmem [shape: f32[1,32], index: 6, kind: input, shape index: {}]   ;;  %s2168_s7 = inlined_call_operand.vmem [shape: f32[1,32], index: 7, kind: input, shape index: {}]   ;;  %s2169_s8 = inlined_call_operand.vmem [shape: bf16[32,128], index: 8, kind: input, shape index: {}]   ;;  %s2170_s9 = inlined_call_operand.vmem [shape: f32[1,128], index: 9, kind: input, shape index: {}]   ;;  %s2171_s10 = inlined_call_operand.vmem [shape: bf16[128,32], index: 10, kind: input, shape index: {}]   ;;  %s2172_s11 = inlined_call_operand.vmem [shape: f32[1,32], index: 11, kind: input, shape index: {}]   ;;  %s2173_s12 = inlined_call_operand.hbm [shape: f32[2,8,32], index: 12, kind: output, shape index: {}]  }
   0x1   :  { %2175 = sst [smem:[#allocation7_spill]] %s2161_s0 }
   0x2   :  { %2176 = sst [smem:[#allocation8_spill]] %s2162_s1 }
   0x3   :  { %2177 = sst [smem:[#allocation9_spill]] %s2163_s2 }
   0x4   :  { %2178 = sst [smem:[#allocation10_spill]] %s2164_s3 }
   0x5   :  { %17 = vsyncpa [#allocation5], 0 }
   0x6   :  { %19 = vsyncpa [#allocation5 + $0x1], 0  ;;  %s1766_s21 = smov 0   ;;  %s1768_s22 = smov 0  }
   0x7   :  { %s1770_s23 = smov 0   ;;  %s1772_s24 = smov 0  }
   0x8   :  { %s1774_s25 = smov 0   ;;  %s1776_s26 = smov 0  }
   0x9 LB: > { %s1206_s27 = sadd.s32 4294967295, %s1638_s26   ;;  %s1207_s28 = sadd.s32 4294967294, %s1638_s26   ;;  %s1638_s26 = sphi %s1776_s26, %s25_s26   ;;  %s1634_s25 = sphi %s1774_s25, %s2206_s25   ;;  %s1630_s24 = sphi %s1772_s24, %s2205_s24   ;;  %s1626_s23 = sphi %s1770_s23, %s2204_s23   ;;  %s1622_s22 = sphi %s1768_s22, %s2203_s22   ;;  %s1618_s21 = sphi %s1766_s21, %s2202_s21  }
   0xa   : > { %s37_s29 = sadd.s32 1, %s1634_s25  ;;  %s305_s30 = sadd.s32 1, %s1626_s23 }
   0xb   : > { %p39_p0 = scmp.ge.s32.totalorder %s37_s29, 2  ;;  %p315_p1 = scmp.ne.s32.totalorder %s1626_s23, %s1622_s22 }
   0xc   : > { %p316_p2 = scmp.eq.s32.totalorder %s1206_s27, 1  ;;  %p321_p3 = scmp.ne.s32.totalorder %s1622_s22, %s1618_s21 }
   0xd   : > { %s2208_s29 = smov (%p39_p0, %s37_s29), 0  ;;  %p322_p5 = scmp.eq.s32.totalorder %s1207_s28, 1 }
   0xe   : > { %p1806_p4 = por %p316_p2, %p315_p1  ;;  %s300_s14 = ssub.s32 %s1634_s25, %s2208_s29 }
   0xf   : > { %p1210_p6 = scmp.ge.s32.totalorder %s1638_s26, 1  ;;  %p303_p7 = scmp.eq.s32.totalorder %s300_s14, 0 }
  0x10   : > { %p1813_p8 = por %p322_p5, %p321_p3  ;;  %p383_p9 = scmp.lt.s32.totalorder %s1638_s26, 3 }
  0x11   : > { %s1819_s16 = scalar_select %p303_p7, %s1626_s23, %s305_s30  }
  0x12   : > { %p384_p10 = pnand %p1210_p6, %p383_p9 }
  0x13   : > { %p427_p11 = scmp.lt.s32.totalorder (!%p384_p10), %s1630_s24, 1  ;;  %s2181_s0 = sld [smem:[#allocation7_spill]] (!%p384_p10) }
  0x14   : > { %387 = sbr.rel (%p384_p10) target bundleno = 1910 (0x776), region = 68  ;;  %s2174_s28 = sand.u32 (!%p384_p10), 1, %s1622_s22  }
  0x15   : > { %s1838_s30 = sshll.u32 (!%p384_p10), %s2174_s28, 3  ;;  %s2182_s1 = sld [smem:[#allocation8_spill]] (!%p384_p10) }
  0x16   : > { %s1694_s19 = smov (!%p384_p10), 120   ;;  %s1695_s20 = smov (!%p384_p10), 112  }
  0x17   : > { %s1697_s14 = smov (!%p384_p10), 64  }
  0x19   : > { %s428_s17 = scalar_select %p427_p11, %s1630_s24, 1  ;;  %vm439_vm0 = vcmask 261120   ;;  %v1692_v2 = vmov 32.0   ;;  %v1469_v23 = vld [vmem:[%s2165_s4] ss:$0 sm:$0xff]  ;;  %vm544_vm5 = vcmask 60416   ;;  %v567_v45 = vlaneseq }
  0x1a   : > { %1471 = vrcp.f32 %v1692_v2  ;;  %v1470_v27 = vld [vmem:[%s2166_s5] ss:$0 sm:$0xff]  ;;  %v1882_v51 = vmov 0.0   ;;  %v1884_v52 = vmov 0.0   ;;  %v1886_v53 = vmov 0.0  }
  0x1b   : > { %s1212_s18 = sshll.u32 %s428_s17, 3  ;;  %v1288_v14 = vld [vmem:[%s2182_s1 + $0x8] sm:$0xff]  ;;  %v1287_v15 = vld [vmem:[%s2182_s1] sm:$0xff]  ;;  %v1876_v47 = vshrl.u32 %v567_v45, 7  ;;  %v1888_v54 = vmov 0.0   ;;  %v1890_v55 = vmov 0.0  }
  0x1c   : > { %s433_s27 = scalar_lea.vmem %s2181_s0, %s1212_s18  ;;  %503 = vmatpush.bf16.msra.mxu0 %v1288_v14  ;;  %s1693_s18 = smov 104   ;;  %v1892_v56 = vmov 0.0   ;;  %v1894_v57 = vmov 0.0   ;;  %v1896_v58 = vmov 0.0   ;;  %v1898_v59 = vmov -inf  }
  0x1d   : > { %v1826_v0 = vld [vmem:[%s433_s27] sm:$0xff]  ;;  %s1696_s27 = smov 96   ;;  %v1900_v60 = vmov -inf   ;;  %v1902_v61 = vmov -inf   ;;  %v1904_v62 = vmov -inf  }
  0x1e   : > { %v440_v1 = vsel %vm439_vm0, %v1826_v0, 0.0 }
  0x1f   : > { %441 = vadd.xlane.f32.xlu0 %v440_v1 }
  0x20   : > { %v1472_v3 = vpop.eup %1471  ;;  %504 = vmatpush.bf16.msra.mxu0 %v1287_v15 }
  0x21   : > { %v444_v4 = vmul.f32 32.0, %v1472_v3  ;;  %vm448_vm1 = vweird.f32 %v1472_v3 }
  0x23   : > { %v445_v5 = vsub.f32 1.0, %v444_v4 }
  0x25   : > { %v446_v6 = vmul.f32 %v1472_v3, %v445_v5 }
  0x27   : > { %v447_v7 = vadd.f32 %v1472_v3, %v446_v6 }
  0x29   : > { %v1830_v8 = vsel %vm448_vm1, %v1472_v3, %v447_v7 }
  0x92   : > { %v442_v9 = vpop.xlane.xlu0 %441 }
  0x93   : > { %v450_v10 = vmul.f32 %v1830_v8, %v442_v9 }
  0x95   : > { %v451_v11 = vsub.f32 %v1826_v0, %v450_v10 }
  0x97   : > { %v452_v12 = vmul.f32 %v451_v11, %v451_v11  ;;  %v460_v26 = vmul.f32 %v1469_v23, %v451_v11 }
  0x99   : > { %v453_v13 = vsel %vm439_vm0, %v452_v12, 0.0 }
  0x9a   : > { %454 = vadd.xlane.f32.xlu0 %v453_v13 }
 0x10d   : > { %v455_v16 = vpop.xlane.xlu0 %454 }
 0x10e   : > { %v456_v17 = vmul.f32 %v455_v16, %v1830_v8 }
 0x110   : > { %v461_v18 = vadd.f32 1e-05, %v456_v17 }
 0x112   : > { %1473 = vrsqrt.f32 %v461_v18  ;;  %vm468_vm3 = vweird.f32 %v461_v18 }
 0x118   : > { %v1474_v19 = vpop.eup %1473 }
 0x119   : > { %v463_v20 = vmul.f32 %v1474_v19, %v461_v18  ;;  %vm469_vm2 = vweird.f32 %v1474_v19 }
 0x11a   : > { %vm470_vm4 = vmor %vm468_vm3, %vm469_vm2 }
 0x11b   : > { %v464_v21 = vmul.f32 %v1474_v19, %v463_v20 }
 0x11d   : > { %v465_v22 = vmul.f32 0.5, %v464_v21 }
 0x11f   : > { %v466_v24 = vsub.f32 1.5, %v465_v22 }
 0x121   : > { %v467_v25 = vmul.f32 %v1474_v19, %v466_v24 }
 0x123   : > { %v471_v28 = vsel %vm470_vm4, %v1474_v19, %v467_v25 }
 0x124   : > { %v472_v29 = vmul.f32 %v471_v28, %v460_v26 }
 0x126   : > { %v476_v30 = vadd.f32 %v1470_v27, %v472_v29 }
 0x128   : > { %v477_v31 = vpack.c.bf16 %v476_v30, %v476_v30 }
 0x12a   : > { %1221 = vmatmul.msk.bf16.vlgmr.msra.gmra.mxu0 %vm439_vm0, %v477_v31 }
 0x1a7   : > { %v506_v32 = vpop.f32.mrf.mxu0 }
 0x1a8   : > { %517 = vrot.lane.b32.xlu2 %v506_v32, %s1693_s18  ;;  %511 = vrot.lane.b32.xlu1 %v506_v32, %s1694_s19  ;;  %v1854_v33 = vpack.c.bf16 %v506_v32, %v506_v32  ;;  %s1906_s18 = smov 0  }
 0x1af   : > { %v508_v34 = vpop.f32.mrf.mxu0 }
 0x1b0   : > { %514 = vrot.lane.b32.xlu1 %v506_v32, %s1695_s20  ;;  %528 = vrot.lane.b32.xlu2 %v1854_v33, %s1696_s27 }
 0x1b8   : > { %549 = vrot.lane.b32.xlu1 %v1854_v33, %s1697_s14 }
 0x202   : > { %v518_v35 = vpop.permute.xlu2 %517 }
 0x203   : > { %v1858_v36 = vpack.c.bf16 %v518_v35, %v518_v35 }
 0x205   : > { %534 = vrot.lane.b32.xlu2 %v1858_v36, %s1696_s27 }
 0x20a   : > { %v529_v37 = vpop.permute.xlu2 %528 }
 0x20b   : > { %545 = vst.msk [vmem:[#allocation2] sm:$0xf] %vm544_vm5, %v529_v37 }
 0x21a   : > { %v512_v38 = vpop.permute.xlu1 %511 }
 0x21b   : > { %v1862_v39 = vpack.c.bf16 %v512_v38, %v512_v38 }
 0x21d   : > { %530 = vrot.lane.b32.xlu0 %v1862_v39, %s1696_s27  ;;  %551 = vrot.lane.b32.xlu2 %v1862_v39, %s1697_s14 }
 0x222   : > { %v515_v40 = vpop.permute.xlu1 %514 }
 0x223   : > { %v1866_v41 = vpack.c.bf16 %v515_v40, %v515_v40 }
 0x225   : > { %532 = vrot.lane.b32.xlu1 %v1866_v41, %s1696_s27  ;;  %555 = vrot.lane.b32.xlu2 %v1858_v36, %s1697_s14 }
 0x22a   : > { %v550_v42 = vpop.permute.xlu1 %549 }
 0x22b   : > { %563 = vst.msk [vmem:[#allocation3] sm:$0xf] %vm544_vm5, %v550_v42 }
 0x22d   : > { %553 = vrot.lane.b32.xlu1 %v1866_v41, %s1697_s14 }
 0x25f   : > { %v535_v43 = vpop.permute.xlu2 %534 }
 0x260   : > { %548 = vst.msk [vmem:[#allocation2 + $0xc] sm:$0xf] %vm544_vm5, %v535_v43 }
 0x277   : > { %v552_v44 = vpop.permute.xlu2 %551 }
 0x278   : > { %564 = vst.msk [vmem:[#allocation3 + $0x4] sm:$0xf] %vm544_vm5, %v552_v44 }
 0x27f   : > { %v556_v46 = vpop.permute.xlu2 %555 }
 0x280   : > { %566 = vst.msk [vmem:[#allocation3 + $0xc] sm:$0xf] %vm544_vm5, %v556_v46 }
 0x28f   : > { %v531_v48 = vpop.permute.xlu0 %530 }
 0x290   : > { %546 = vst.msk [vmem:[#allocation2 + $0x4] sm:$0xf] %vm544_vm5, %v531_v48 }
 0x297   : > { %v533_v49 = vpop.permute.xlu1 %532 }
 0x298   : > { %547 = vst.msk [vmem:[#allocation2 + $0x8] sm:$0xf] %vm544_vm5, %v533_v49 }
 0x29f   : > { %v554_v50 = vpop.permute.xlu1 %553 }
 0x2a0   : > { %565 = vst.msk [vmem:[#allocation3 + $0x8] sm:$0xf] %vm544_vm5, %v554_v50 }
 0x2a1 LB: >> { %s1222_s19 = sshll.u32 %s1690_s18, 3  ;;  %vm605_vm6 = vcmask 64512   ;;  %v683_v9 = vand.u32 127, %v567_v45  ;;  %vm764_vm8 = vcmask 1043456   ;;  %s575_s18 = sadd.s32 1, %s1690_s18   ;;  %s1690_s18 = sphi %s1906_s18, %s575_s18   ;;  %v1686_v62 = vphi %v1904_v62, %v2196_v62   ;;  %v1682_v61 = vphi %v1902_v61, %v2195_v61   ;;  %v1678_v60 = vphi %v1900_v60, %v2194_v60   ;;  %v1674_v59 = vphi %v1898_v59, %v2193_v59   ;;  %v1670_v58 = vphi %v1896_v58, %v2192_v58   ;;  %v1666_v57 = vphi %v1894_v57, %v2191_v57   ;;  %v1662_v56 = vphi %v1892_v56, %v2190_v56   ;;  %v1658_v55 = vphi %v1890_v55, %v2189_v55   ;;  %v1654_v54 = vphi %v1888_v54, %v2188_v54   ;;  %v1650_v53 = vphi %v1886_v53, %v2187_v53   ;;  %v1646_v52 = vphi %v1884_v52, %v2186_v52   ;;  %v1642_v51 = vphi %v1882_v51, %v2185_v51  }
 0x2a2   : >> { %s1948_s20 = sshra.s32 %s1222_s19, 3  ;;  %v684_v10 = vstv %s1222_s19  ;;  %p2016_p12 = scmp.ge.s32.totalorder %s575_s18, 1 }
 0x2a3   : >> { %s1223_s27 = sshll.u32 %s1948_s20, 2  ;;  %v685_v11 = vadd.s32 %v684_v10, %v683_v9  ;;  %s2197_s2 = sld [smem:[#allocation9_spill]] (%p2016_p12)  ;;  %vm864_vm9 = vcmask (%p2016_p12), 130048   ;;  %vm866_vm10 = vcmask (%p2016_p12), 195584  }
 0x2a4   : >> { %s594_s14 = scalar_lea.vmem [#allocation2], %s1223_s27  ;;  %s600_s19 = scalar_lea.vmem [#allocation3], %s1223_s27 }
 0x2a5   : >> { %v595_v63 = vld [vmem:[%s594_s14] sm:$0xf]  ;;  %v597_v1 = vld [vmem:[%s594_s14 + $0x8] sm:$0xf]  ;;  %v598_v2 = vld [vmem:[%s594_s14 + $0xc] sm:$0xf]  ;;  %vm686_vm7 = vcmp.le.s32.totalorder %v685_v11, %v1876_v47 }
 0x2a6   : >> { %v610_v3 = vsel %vm605_vm6, %v595_v63, 0  ;;  %v648_v4 = vsel %vm605_vm6, %v597_v1, 0  ;;  %v667_v5 = vsel %vm605_vm6, %v598_v2, 0  ;;  %v596_v6 = vld [vmem:[%s594_s14 + $0x4] sm:$0xf]  ;;  %s1698_s27 = smov (%p2016_p12), 8  }
 0x2a7   : >> { %619 = vmatpush.bf16.xpose.msra.mxu0 %v610_v3  ;;  %657 = vmatpush.bf16.xpose.msra.mxu2 %v648_v4  ;;  %v629_v7 = vsel %vm605_vm6, %v596_v6, 0  ;;  %v601_v28 = vld [vmem:[%s600_s19] sm:$0xf]  ;;  %v603_v30 = vld [vmem:[%s600_s19 + $0x8] sm:$0xf]  ;;  %s1699_s14 = smov (%p2016_p12), 24  }
 0x2a8   : >> { %676 = vmatpush.bf16.xpose.msra.mxu3 %v667_v5  ;;  %638 = vmatpush.bf16.xpose.msra.mxu1 %v629_v7  ;;  %v766_v29 = vsel %vm764_vm8, %v601_v28, 0  ;;  %v604_v31 = vld [vmem:[%s600_s19 + $0xc] sm:$0xf]  ;;  %v804_v32 = vsel %vm764_vm8, %v603_v30, 0  ;;  %v602_v35 = vld [vmem:[%s600_s19 + $0x4] sm:$0xf] }
 0x2a9   : >> { %v823_v34 = vsel %vm764_vm8, %v604_v31, 0  ;;  %v785_v37 = vsel %vm764_vm8, %v602_v35, 0  ;;  %s1700_s19 = smov (%p2016_p12), 16   ;;  %s2198_s3 = sld [smem:[#allocation10_spill]] (%p2016_p12) }
 0x2aa   : > { %s1284_s1 = sshll.u32 (%p2016_p12), %s1630_s24, 3  ;;  %s2199_s18 = scalar_lea.vmem (%p2016_p12), [#allocation4], %s1838_s30 }
 0x2ab   : > { %s1083_s20 = sshll.u32 (%p2016_p12), %s2199_s18, 4  ;;  %s2200_s24 = smov (%p2016_p12), %s2199_s18  ;;  %s1084_s20 = int_to_ptr.vmem [resolvable:$true] %s1083_s20 }
 0x2ac   : > { %s2201_s17 = sand.u32 (%p2016_p12), 1, %s1622_s22   ;;  %s1528_s0 = scalar_lea.hbm (%p2016_p12), %s2173_s12, 16 }
 0x2ae   : >> { %1225 = vmatmul.msk.bf16.vlgmr.msra.gmra.mxu0 %vm605_vm6, %v1854_v33  ;;  %1227 = vmatmul.msk.bf16.vlgmr.msra.gmra.mxu2 %vm605_vm6, %v1866_v41  ;;  %v1289_v33 = vld [vmem:[%s2197_s2] sm:$0xff] (%p2016_p12) }
 0x2af   : >> { %1228 = vmatmul.msk.bf16.vlgmr.msra.gmra.mxu3 %vm605_vm6, %v1858_v36  ;;  %1226 = vmatmul.msk.bf16.vlgmr.msra.gmra.mxu1 %vm605_vm6, %v1862_v39 }
 0x2b0   : >> { %775 = vmatpush.bf16.msrb.mxu0 %v766_v29  ;;  %813 = vmatpush.bf16.msrb.mxu2 %v804_v32 }
 0x2b1   : >> { %832 = vmatpush.bf16.msrb.mxu3 %v823_v34  ;;  %794 = vmatpush.bf16.msrb.mxu1 %v785_v37 }
 0x32b   : >> { %v621_v12 = vpop.f32.mrf.mxu0 }
 0x32c   : >> { %v689_v13 = vsel %vm686_vm7, %v621_v12, -inf  ;;  %v640_v14 = vpop.f32.mrf.mxu1 }
 0x32d   : >> { %v693_v15 = vsel %vm605_vm6, %v689_v13, -inf  ;;  %v690_v16 = vsel %vm686_vm7, %v640_v14, -inf }
 0x32e   : >> { %694 = vmax.xlane.f32.xlu1 %v693_v15  ;;  %v696_v21 = vsel %vm605_vm6, %v690_v16, -inf }
 0x331   : >> { %v659_v17 = vpop.f32.mrf.mxu2 }
 0x332   : >> { %v691_v18 = vsel %vm686_vm7, %v659_v17, -inf  ;;  %v678_v19 = vpop.f32.mrf.mxu3 }
 0x333   : >> { %v699_v20 = vsel %vm605_vm6, %v691_v18, -inf  ;;  %v623_v22 = vpop.f32.mrf.mxu0  ;;  %v692_v24 = vsel %vm686_vm7, %v678_v19, -inf }
 0x334   : >> { %700 = vmax.xlane.f32.xlu0 %v699_v20  ;;  %v642_v23 = vpop.f32.mrf.mxu1  ;;  %v702_v26 = vsel %vm605_vm6, %v692_v24, -inf }
 0x336   : >> { %697 = vmax.xlane.f32.xlu1 %v696_v21 }
 0x339   : >> { %v661_v25 = vpop.f32.mrf.mxu2 }
 0x33a   : >> { %v680_v27 = vpop.f32.mrf.mxu3 }
 0x33c   : >> { %703 = vmax.xlane.f32.xlu0 %v702_v26 }
 0x3a1   : >> { %v695_v38 = vpop.xlane.xlu1 %694 }
 0x3a2   : >> { %v1974_v40 = vmax.f32 %v1686_v62, %v695_v38  }
 0x3a4   : >> { %v709_v42 = vsub.f32 %v1686_v62, %v1974_v40  ;;  %v721_v43 = vsub.f32 %v689_v13, %v1974_v40 }
 0x3a6   : >> { %v725_v44 = vmul.f32 1.442695, %v721_v43  ;;  %v713_v20 = vmul.f32 1.442695, %v709_v42 }
 0x3a7   : >> { %v701_v46 = vpop.xlane.xlu0 %700 }
 0x3a8   : >> { %v1980_v48 = vmax.f32 %v1678_v60, %v701_v46   ;;  %1475 = vpow2.f32 %v725_v44 }
 0x3a9   : >> { %v698_v49 = vpop.xlane.xlu1 %697 }
 0x3aa   : >> { %v711_v50 = vsub.f32 %v1678_v60, %v1980_v48  ;;  %v723_v63 = vsub.f32 %v691_v18, %v1980_v48  ;;  %v1986_v1 = vmax.f32 %v1682_v61, %v698_v49  }
 0x3ac   : >> { %v729_v2 = vmul.f32 1.442695, %v723_v63  ;;  %v710_v62 = vsub.f32 %v1682_v61, %v1986_v1  ;;  %v722_v3 = vsub.f32 %v690_v16, %v1986_v1  ;;  %v717_v21 = vmul.f32 1.442695, %v711_v50 }
 0x3ae   : >> { %v727_v4 = vmul.f32 1.442695, %v722_v3  ;;  %v1476_v5 = vpop.eup %1475  ;;  %1477 = vpow2.f32 %v729_v2  ;;  %v715_v22 = vmul.f32 1.442695, %v710_v62 }
 0x3af   : >> { %v704_v6 = vpop.xlane.xlu0 %703  ;;  %v737_v60 = vsel %vm605_vm6, %v1476_v5, 0.0  ;;  %v757_v9 = vpack.c.bf16 %v1476_v5, %v1476_v5 }
 0x3b0   : >> { %v1992_v7 = vmax.f32 %v1674_v59, %v704_v6   ;;  %1479 = vpow2.f32 %v727_v4  ;;  %738 = vadd.xlane.f32.xlu2 %v737_v60 }
 0x3b1   : >> { %1229 = vmatmul.msk.bf16.vlgmr.msrb.gmra.mxu0 %vm605_vm6, %v757_v9 }
 0x3b2   : >> { %v712_v10 = vsub.f32 %v1674_v59, %v1992_v7  ;;  %v724_v11 = vsub.f32 %v692_v24, %v1992_v7 }
 0x3b4   : >> { %v731_v61 = vmul.f32 1.442695, %v724_v11  ;;  %v1478_v12 = vpop.eup %1477  ;;  %v719_v25 = vmul.f32 1.442695, %v712_v10 }
 0x3b5   : >> { %v743_v13 = vsel %vm605_vm6, %v1478_v12, 0.0  ;;  %v759_v14 = vpack.c.bf16 %v1478_v12, %v1478_v12 }
 0x3b6   : >> { %v1480_v15 = vpop.eup %1479  ;;  %1481 = vpow2.f32 %v731_v61  ;;  %744 = vadd.xlane.f32.xlu0 %v743_v13  ;;  %v2195_v61 = vmov %v1986_v1 }
 0x3b7   : >> { %1231 = vmatmul.msk.bf16.vlgmr.msrb.gmra.mxu2 %vm605_vm6, %v759_v14  ;;  %v740_v16 = vsel %vm605_vm6, %v1480_v15, 0.0  ;;  %v758_v17 = vpack.c.bf16 %v1480_v15, %v1480_v15  ;;  %1483 = vpow2.f32 %v713_v20  ;;  %v1491_v61 = vld [vmem:[%s2198_s3] ss:$0 sm:$0xff] (%p2016_p12) }
 0x3b8   : >> { %741 = vadd.xlane.f32.xlu2 %v740_v16  ;;  %1485 = vpow2.f32 %v717_v21 }
 0x3b9   : >> { %1230 = vmatmul.msk.bf16.vlgmr.msrb.gmra.mxu1 %vm605_vm6, %v758_v17  ;;  %1487 = vpow2.f32 %v715_v22  ;;  %v1291_v22 = vld [vmem:[%s2169_s8] sm:$0xff] (%p2016_p12) }
 0x3ba   : >> { %1489 = vpow2.f32 %v719_v25 }
 0x3bc   : >> { %v1482_v59 = vpop.eup %1481 }
 0x3bd   : >> { %v746_v18 = vsel %vm605_vm6, %v1482_v59, 0.0  ;;  %v760_v19 = vpack.c.bf16 %v1482_v59, %v1482_v59  ;;  %v1484_v23 = vpop.eup %1483  ;;  %v2193_v59 = vmov %v1992_v7 }
 0x3be   : >> { %747 = vadd.xlane.f32.xlu1 %v746_v18  ;;  %v733_v24 = vmul.f32 %v1670_v58, %v1484_v23  ;;  %v1486_v28 = vpop.eup %1485  ;;  %v753_v42 = vmul.f32 %v1654_v54, %v1484_v23  ;;  %v1300_v23 = vld [vmem:[%s2171_s10 + $0x38] sm:$0xff] (%p2016_p12) }
 0x3bf   : >> { %1232 = vmatmul.msk.bf16.vlgmr.msrb.gmra.mxu3 %vm605_vm6, %v760_v19  ;;  %v1488_v29 = vpop.eup %1487  ;;  %v735_v30 = vmul.f32 %v1662_v56, %v1486_v28  ;;  %v755_v56 = vmul.f32 %v1646_v52, %v1486_v28  ;;  %1054 = vmatpush.bf16.msra.mxu2 (%p2016_p12), %v1300_v23 }
 0x3c0   : >> { %v734_v34 = vmul.f32 %v1666_v57, %v1488_v29  ;;  %v1490_v38 = vpop.eup %1489 }
 0x3c1   : >> { %v736_v46 = vmul.f32 %v1658_v55, %v1490_v38  ;;  %v756_v5 = vmul.f32 %v1642_v51, %v1490_v38 }
 0x423   : >> { %v739_v26 = vpop.xlane.xlu2 %738 }
 0x424   : >> { %v2006_v58 = vadd.f32 %v739_v26, %v733_v24   ;;  %v1299_v24 = vld [vmem:[%s2171_s10 + $0x30] sm:$0xff] (%p2016_p12) }
 0x425   : > { %1055 = vmatpush.bf16.msra.mxu2 (%p2016_p12), %v1299_v24 }
 0x426   : >> { %v2183_v27 = vmov %v2006_v58  ;;  %v754_v58 = vmul.f32 %v1650_v53, %v1488_v29 }
 0x429   : >> { %v745_v31 = vpop.xlane.xlu0 %744 }
 0x42a   : >> { %v751_v32 = vadd.f32 %v745_v31, %v735_v30  }
 0x42b   : >> { %v742_v35 = vpop.xlane.xlu2 %741 }
 0x42c   : >> { %v750_v37 = vadd.f32 %v742_v35, %v734_v34  }
 0x42e   : >> { %v777_v43 = vpop.f32.mrf.mxu0  ;;  %1496 = vrcp.f32 (%p2016_p12), %v750_v37 }
 0x42f   : >> { %v838_v44 = vadd.f32 %v777_v43, %v753_v42  }
 0x431   : >> { %v748_v49 = vpop.xlane.xlu1 %747 }
 0x432   : >> { %v752_v50 = vadd.f32 %v748_v49, %v736_v46   ;;  %v1298_v46 = vld [vmem:[%s2171_s10 + $0x28] sm:$0xff] (%p2016_p12)  ;;  %v1297_v49 = vld [vmem:[%s2171_s10 + $0x20] sm:$0xff] (%p2016_p12) }
 0x433   : > { %1056 = vmatpush.bf16.msra.mxu2 (%p2016_p12), %v1298_v46 }
 0x434   : >> { %v2189_v55 = vmov %v752_v50  ;;  %1498 = vrcp.f32 (%p2016_p12), %v752_v50  ;;  %v1497_v10 = vpop.eup (%p2016_p12), %1496  ;;  %v1296_v50 = vld [vmem:[%s2171_s10 + $0x18] sm:$0xff] (%p2016_p12) }
 0x435   : > { %1500 = vrcp.f32 (%p2016_p12), %v751_v32 }
 0x436   : >> { %v779_v63 = vpop.f32.mrf.mxu0  ;;  %v796_v2 = vpop.f32.mrf.mxu1  ;;  %1502 = vrcp.f32 (%p2016_p12), %v2183_v27 }
 0x437   : >> { %v839_v3 = vadd.f32 %v796_v2, %v754_v58   ;;  %v2192_v58 = vmov %v2183_v27  ;;  %1057 = vmatpush.bf16.msra.mxu2 (%p2016_p12), %v1297_v49  ;;  %v1294_v63 = vld [vmem:[%s2171_s10 + $0x8] sm:$0xff] (%p2016_p12)  ;;  %v1293_v2 = vld [vmem:[%s2171_s10] sm:$0xff] (%p2016_p12) }
 0x438   : > { %v1295_v58 = vld [vmem:[%s2171_s10 + $0x10] sm:$0xff] (%p2016_p12) }
 0x439   : >> { %v2187_v53 = vmov %v839_v3  ;;  %v847_v11 = vmul.f32 (%p2016_p12), %v1497_v10, %v839_v3  ;;  %v1494_v3 = vld [vmem:[%s2170_s9] ss:$0 sm:$0xff] (%p2016_p12) }
 0x43a   : >> { %v815_v62 = vpop.f32.mrf.mxu2  ;;  %v1499_v12 = vpop.eup (%p2016_p12), %1498 }
 0x43b   : >> { %v840_v4 = vadd.f32 %v815_v62, %v755_v56   ;;  %v2190_v56 = vmov %v751_v32  ;;  %v2196_v62 = vmov %v1974_v40  ;;  %851 = vrot.lane.b32.xlu0 (%p2016_p12), %v847_v11, %s1698_s27  ;;  %v1290_v40 = vld [vmem:[%s2197_s2 + $0x8] sm:$0xff] (%p2016_p12)  ;;  %v1492_v32 = vld [vmem:[%s2167_s6] ss:$0 sm:$0xff] (%p2016_p12)  ;;  %1058 = vmatpush.bf16.msra.mxu2 (%p2016_p12), %v1296_v50  ;;  %s1070_s2 = scalar_lea.sflag (%p2016_p12), [#allocation5], %s2201_s17 }
 0x43c   : > { %894 = vmatpush.bf16.msra.mxu0 (%p2016_p12), %v1290_v40 }
 0x43d   : >> { %v2186_v52 = vmov %v840_v4 }
 0x43e   : >> { %v798_v57 = vpop.f32.mrf.mxu1 }
 0x43f   : >> { %v2191_v57 = vmov %v750_v37  ;;  %1059 = vmatpush.bf16.msra.mxu2 (%p2016_p12), %v1295_v58 }
 0x440   : > { %895 = vmatpush.bf16.msra.mxu0 (%p2016_p12), %v1289_v33 }
 0x442   : >> { %v817_v6 = vpop.f32.mrf.mxu2  ;;  %v834_v54 = vpop.f32.mrf.mxu3 }
 0x443   : >> { %v841_v9 = vadd.f32 %v834_v54, %v756_v5   ;;  %v2188_v54 = vmov %v838_v44  ;;  %1060 = vmatpush.bf16.msra.mxu2 (%p2016_p12), %v1294_v63 }
 0x445   : >> { %v2185_v51 = vmov %v841_v9  ;;  %v849_v7 = vmul.f32 (%p2016_p12), %v1499_v12, %v841_v9 }
 0x447   : > { %577 = sbr.rel (!%p2016_p12) target bundleno = 673 (0x2a1), region = 114  ;;  %859 = vrot.lane.b32.xlu1 (%p2016_p12), %v849_v7, %s1699_s14  ;;  %1061 = vmatpush.bf16.msra.mxu2 (%p2016_p12), %v1293_v2 }
 0x44a   : >> { %v836_v60 = vpop.f32.mrf.mxu3 }
 0x44b   : >> { %v2194_v60 = vmov %v1980_v48  ;;  %v1501_v48 = vpop.eup (%p2016_p12), %1500 }
 0x44c   : > { %v848_v1 = vmul.f32 %v1501_v48, %v840_v4  ;;  %v1503_v39 = vpop.eup %1502  ;;  %v1495_v48 = vld [vmem:[%s2172_s11] ss:$0 sm:$0xff] }
 0x44d   : > { %v846_v41 = vmul.f32 %v1503_v39, %v838_v44 }
 0x44e   : > { %855 = vrot.lane.b32.xlu0 %v848_v1, %s1700_s19  ;;  %s1081_s19 = scalar_lea.hbm %s2173_s12, %s1284_s1 }
 0x44f   : > { %s1085_s28 = sshll.u32 %s1081_s19, 4  ;;  %s1086_s28 = int_to_ptr.hbm [resolvable:$true] %s1085_s28 }
 0x450   : > { %s1522_s27 = sshra.s32 %s1086_s28, 4  ;;  %s1523_s27 = int_to_ptr.hbm [resolvable:$true] %s1522_s27 }
 0x451   : > { %s1524_s3 = scalar_lea.hbm %s1523_s27, 8  ;;  %p1529_p2 = scmp.lt.s32.totalorder %s1523_s27, %s2173_s12 }
 0x452   : > { %p1525_p13 = scmp.ne.s32.totalorder %s1523_s27, %s1524_s3  ;;  %p1530_p3 = scmp.lt.s32.totalorder %s1528_s0, %s1524_s3 }
 0x454   : > { %p1526_p0 = pnand %p1525_p13, %p1806_p4  ;;  %p1531_p5 = por %p1530_p3, %p1529_p2 }
 0x456   : > { %p1527_p1 = pneg %p1526_p0 }
 0x458   : > { %p1532_p6 = pnand %p1531_p5, %p1527_p1 }
 0x4ad   : > { %v852_v36 = vpop.permute.xlu0 %851 }
 0x4ae   : > { %v863_v47 = vsel %vm605_vm6, %v846_v41, %v852_v36 }
 0x4b9   : > { %v860_v45 = vpop.permute.xlu1 %859 }
 0x4c0   : > { %v856_v51 = vpop.permute.xlu0 %855 }
 0x4c1   : > { %v865_v52 = vsel %vm864_vm9, %v863_v47, %v856_v51 }
 0x4c2   : > { %v867_v53 = vsel %vm866_vm10, %v865_v52, %v860_v45 }
 0x4c3   : > { %v868_v55 = vpack.c.bf16 %v867_v53, %v867_v53 }
 0x4c5   : > { %1241 = vmatmul.msk.bf16.vlgmr.msra.gmra.mxu0 %vm439_vm0, %v868_v55 }
 0x542   : > { %v897_v13 = vpop.f32.mrf.mxu0 }
 0x543   : > { %v901_v14 = vadd.f32 %v897_v13, %v1826_v0  ;;  %v1292_v0 = vld [vmem:[%s2169_s8 + $0x8] sm:$0xff] }
 0x544   : > { %969 = vmatpush.bf16.msra.mxu1 %v1292_v0 }
 0x545   : > { %v2066_v15 = vadd.f32 %v1491_v61, %v901_v14 }
 0x547   : > { %v909_v16 = vsel %vm439_vm0, %v2066_v15, 0.0 }
 0x548   : > { %910 = vadd.xlane.f32.xlu1 %v909_v16  ;;  %970 = vmatpush.bf16.msra.mxu1 %v1291_v22 }
 0x54a   : > { %v899_v17 = vpop.f32.mrf.mxu0 }
 0x5bb   : > { %v911_v59 = vpop.xlane.xlu1 %910 }
 0x5bc   : > { %v912_v18 = vmul.f32 %v911_v59, %v1830_v8 }
 0x5be   : > { %v913_v19 = vsub.f32 %v2066_v15, %v912_v18 }
 0x5c0   : > { %v914_v20 = vmul.f32 %v913_v19, %v913_v19  ;;  %v922_v37 = vmul.f32 %v1492_v32, %v913_v19 }
 0x5c2   : > { %v915_v21 = vsel %vm439_vm0, %v914_v20, 0.0 }
 0x5c3   : > { %916 = vadd.xlane.f32.xlu2 %v915_v21 }
 0x636   : > { %v917_v25 = vpop.xlane.xlu2 %916 }
 0x637   : > { %v918_v26 = vmul.f32 %v917_v25, %v1830_v8  ;;  %v1493_v8 = vld [vmem:[%s2168_s7] ss:$0 sm:$0xff] }
 0x639   : > { %v923_v27 = vadd.f32 1e-05, %v918_v26 }
 0x63b   : > { %1504 = vrsqrt.f32 %v923_v27  ;;  %vm930_vm12 = vweird.f32 %v923_v27 }
 0x641   : > { %v1505_v28 = vpop.eup %1504 }
 0x642   : > { %v925_v29 = vmul.f32 %v1505_v28, %v923_v27  ;;  %vm931_vm11 = vweird.f32 %v1505_v28 }
 0x643   : > { %vm932_vm13 = vmor %vm930_vm12, %vm931_vm11 }
 0x644   : > { %v926_v30 = vmul.f32 %v1505_v28, %v925_v29 }
 0x646   : > { %v927_v31 = vmul.f32 0.5, %v926_v30 }
 0x648   : > { %v928_v34 = vsub.f32 1.5, %v927_v31 }
 0x64a   : > { %v929_v35 = vmul.f32 %v1505_v28, %v928_v34 }
 0x64c   : > { %v933_v38 = vsel %vm932_vm13, %v1505_v28, %v929_v35 }
 0x64d   : > { %v934_v42 = vmul.f32 %v933_v38, %v922_v37 }
 0x64f   : > { %v938_v43 = vadd.f32 %v1493_v8, %v934_v42 }
 0x651   : > { %v939_v44 = vpack.c.bf16 %v938_v43, %v938_v43 }
 0x653   : > { %1250 = vmatmul.msk.bf16.vlgmr.msra.gmra.mxu1 %vm439_vm0, %v939_v44 }
 0x6d0   : > { %v972_v56 = vpop.f32.mrf.mxu1 }
 0x6d1   : > { %v973_v62 = vadd.f32 %v1494_v3, %v972_v56 }
 0x6d3   : > { %v977_v4 = vmul.f32 %v973_v62, %v973_v62  ;;  %v976_v10 = vmul.f32 0.5, %v973_v62 }
 0x6d5   : > { %v978_v57 = vmul.f32 %v977_v4, %v973_v62 }
 0x6d7   : > { %v979_v5 = vmul.f32 0.044715, %v978_v57 }
 0x6d8   : > { %v974_v6 = vpop.f32.mrf.mxu1 }
 0x6d9   : > { %v980_v54 = vadd.f32 %v979_v5, %v973_v62 }
 0x6db   : > { %v981_v9 = vmul.f32 0.7978845, %v980_v54 }
 0x6dd   : > { %1506 = vtanh.f32 %v981_v9 }
 0x6e3   : > { %v1507_v60 = vpop.eup %1506 }
 0x6e4   : > { %v983_v11 = vadd.f32 1.0, %v1507_v60 }
 0x6e6   : > { %v984_v12 = vmul.f32 %v983_v11, %v976_v10 }
 0x6e8   : > { %v985_v7 = vpack.c.bf16 %v984_v12, %v984_v12 }
 0x6ea   : > { %1062 = vmatmul.bf16.vlgmr.msra.gmra.mxu2 %v985_v7 }
 0x76d   : > { %v1063_v1 = vpop.f32.mrf.mxu2 }
 0x76e   : > { %v1064_v40 = vadd.f32 %v1495_v48, %v1063_v1 }
 0x770   : > { %v1067_v33 = vadd.f32 %v1064_v40, %v2066_v15 }
 0x772   : > { %1068 = vst.msk [vmem:[%s2200_s24] sm:$0xff] %vm439_vm0, %v1067_v33 }
 0x773   : > { %1535 = shalt.err (!%p1532_p6)
}
 0x774   : > { %1301 = dma.vmem_to_hbm [thread:$0]  (%p1806_p4), %s1084_s20, 128, %s1086_s28, %s1070_s2  }
 0x775   : > { %v1065_v36 = vpop.f32.mrf.mxu2 }
 0x776 PF: > { %p1307_p7 = scmp.ge.s32.totalorder %s1638_s26, 2  ;;  %s1097_s30 = sand.u32 1, %s1618_s21  }
 0x777   : > { %s1098_s24 = scalar_lea.sflag [#allocation5], %s1097_s30 }
 0x778   : > { %p1304_p9 = pnand %p1307_p7, %p1813_p8 }
 0x77a   : > { %p1305_p10 = pneg %p1304_p9 }
 0x77c   : > { %1613 = dma.done.wait (%p1305_p10), %s1098_s24, 128  }
 0x77d   : > { %1615 = vsyncadd (%p1305_p10), %s1098_s24, 4294967168  ;;  %s25_s26 = sadd.s32 1, %s1638_s26   ;;  %s2202_s21 = smov %s1622_s22 }
 0x77e   : > { %p22_p11 = scmp.ge.s32.totalorder %s25_s26, 4   ;;  %s2203_s22 = smov %s1626_s23 }
 0x77f   : > { %s2204_s23 = smov %s1819_s16  ;;  %s2205_s24 = smov %s1634_s25 }
 0x780   : > { %s2206_s25 = smov %s2208_s29  ;;  %24 = sbr.rel (!%p22_p11) target bundleno = 9 (0x9), region = 125 }
 0x785   :  { %1104 = vsyncpa [#allocation5], 1 }
 0x786   :  { %1106 = vsyncpa [#allocation5 + $0x1], 1 }

</bundles_post_ra>
